<compile_context>
chip_gen: v7x
topology: tpu7x:2x2x1
jax: 0.10.0
libtpu: 0.0.40
codegen_flags: <defaults>
</compile_context>

<pallas_src>
import functools

import jax
import jax.numpy as jnp
from jax import lax
from jax.experimental import pallas as pl
from jax.experimental.pallas import tpu as pltpu

_BN_EPS = 1e-5
_NPASS = 3                  # conv2-stats sweep, conv3-stats sweep, finalize sweep
_MiB = 1024 * 1024
_LANE = 128
_HARD_MAX_TILE = 16384      # lanes

_VMEM_CAP_CACHE = None


def _vmem_capacity_bytes():
    """Physical per-core VMEM, device-aware (falls back to 64 MiB == v7x)."""
    global _VMEM_CAP_CACHE
    if _VMEM_CAP_CACHE is None:
        cap = None
        try:
            cap = getattr(pltpu.get_tpu_info(), "vmem_capacity_bytes", None)
        except Exception:
            cap = None
        _VMEM_CAP_CACHE = int(cap) if cap else 64 * _MiB
    return _VMEM_CAP_CACHE


def _round_up(x, m):
    return (x + m - 1) // m * m


def _plan_tiling(per_batch, cin, c1, c2, c3, vmem_limit):
    """Pick (TP, per_batch_padded).

    TP is a multiple of 128 that divides the padded per-batch point count and
    whose worst-pass working set stays within ~40% of the scoped VMEM limit
    (so bigger tiles are chosen automatically on 128-MiB parts)."""
    per_batch_p = _round_up(max(per_batch, 1), _LANE)
    # Worst-pass per-lane bytes: double-buffered bf16 x tile + f32/bf16 temps
    # for all three conv outputs (generous slack).
    bytes_per_lane = 4 * cin + 6 * (c1 + c2 + c3)
    cap = int(0.4 * vmem_limit) // max(bytes_per_lane, 1)
    cap = max(_LANE, min(_HARD_MAX_TILE, cap - cap % _LANE))
    tp = _LANE
    d = cap
    while d >= _LANE:                      # largest 128-multiple divisor <= cap
        if per_batch_p % d == 0:
            tp = d
            break
        d -= _LANE
    return tp, per_batch_p


# --------------------------------------------------------------------------
# Pallas kernel: 3x (1x1 conv -> BN(train) -> ReLU) + per-batch max pool,
# 3-pass schedule over a (pass, batch, point-tile) grid.  Layer-1 BN stats are
# analytic (precomputed scale/shift); layers 2/3 use persistent-scratch sums.
# --------------------------------------------------------------------------
def make_msg_scale_kernel(n_valid_total, TP, T, per_batch_valid, padded,
                          x_resident):
    inv_n = 1.0 / float(n_valid_total)     # BN stats span all valid points

    def kernel(x_ref,
               w1_ref, sc1_ref, sh1_ref,
               w2_ref, g2_ref, be2_ref,
               w3_ref, g3_ref, be3_ref,
               out_ref,
               s2, q2, s3, q3):
        p = pl.program_id(0)               # pass
        b = pl.program_id(1)               # batch element
        t = pl.program_id(2)               # point tile inside this batch element
        first_tile = jnp.logical_and(b == 0, t == 0)

        if x_resident:
            # Whole slab resident in VMEM (fetched from HBM exactly once);
            # select this step's tile by dynamic leading-axis index.
            x = x_ref[b * T + t]           # (Cin, TP) bf16
        else:
            x = x_ref[0]                   # streamed (1, Cin, TP) tile

        if padded:
            lane_pos = t * TP + lax.broadcasted_iota(jnp.int32, (1, TP), 1)
            valid = lane_pos < per_batch_valid       # (1, TP) pad-lane mask
        else:
            valid = None

        def conv(h, w_ref):
            # 1x1 conv == (Cout, Cin) @ (Cin, TP) on the MXU, f32 accumulation.
            # Conv bias omitted: it cancels exactly in BN's mean subtraction.
            return jnp.dot(w_ref[...], h.astype(w_ref.dtype),
                           preferred_element_type=jnp.float32)

        def affine_relu(z, scale, shift):
            # BN folded into per-channel scale/shift: mul + add + max only.
            return jnp.maximum(z * scale + shift, 0.0)

        def bn_coeffs(s_ref, q_ref, g_ref, be_ref):
            mean = s_ref[...] * inv_n                                 # (C, 1)
            var = jnp.maximum(q_ref[...] * inv_n - mean * mean, 0.0)  # biased
            scale = g_ref[...] * lax.rsqrt(var + _BN_EPS)
            shift = be_ref[...] - mean * scale
            return scale, shift

        def accum_stats(z, s_ref, q_ref):
            # Cross-tile sum / sum-of-squares (scratch persists across the grid)
            # -> exact training-mode BN despite row tiling.
            @pl.when(first_tile)
            def _():
                s_ref[...] = jnp.zeros_like(s_ref)
                q_ref[...] = jnp.zeros_like(q_ref)
            if padded:
                z = jnp.where(valid, z, 0.0)
            s_ref[...] += jnp.sum(z, axis=1, keepdims=True)
            q_ref[...] += jnp.sum(z * z, axis=1, keepdims=True)

        def layer1():
            return affine_relu(conv(x, w1_ref), sc1_ref[...], sh1_ref[...])

        @pl.when(p == 0)       # stats of layer-2 conv output (layer-1 analytic)
        def _():
            accum_stats(conv(layer1(), w2_ref), s2, q2)

        @pl.when(p == 1)       # stats of layer-3 conv output
        def _():
            sc2, sh2 = bn_coeffs(s2, q2, g2_ref, be2_ref)
            h2 = affine_relu(conv(layer1(), w2_ref), sc2, sh2)
            accum_stats(conv(h2, w3_ref), s3, q3)

        @pl.when(p == 2)       # full chain + per-batch max pool
        def _():
            sc2, sh2 = bn_coeffs(s2, q2, g2_ref, be2_ref)
            sc3, sh3 = bn_coeffs(s3, q3, g3_ref, be3_ref)
            h2 = affine_relu(conv(layer1(), w2_ref), sc2, sh2)
            h3 = affine_relu(conv(h2, w3_ref), sc3, sh3)
            if padded:
                h3 = jnp.where(valid, h3, -jnp.inf)
            tile_max = jnp.max(h3, axis=1, keepdims=True)             # (C3, 1)
            # Running per-batch max kept in the resident (C3, B) output block;
            # column b is selected with an iota mask (no dynamic lane stores).
            lane = lax.broadcasted_iota(jnp.int32, out_ref.shape, 1)
            cur = out_ref[...]
            cur = jnp.where(jnp.logical_and(lane == b, t == 0), -jnp.inf, cur)
            out_ref[...] = jnp.where(lane == b, jnp.maximum(cur, tile_max), cur)

    return kernel


def run_scale_mlp(grouped, params):
    """grouped: (B, per_batch, 3+C) float32 grouped features for one scale.
    Returns (B, C3) float32 max-pooled features."""
    B, per_batch, Cin = grouped.shape
    (w1, _, g1, be1), (w2, _, g2, be2), (w3, _, g3, be3) = params
    C1, C2, C3 = w1.shape[1], w2.shape[1], w3.shape[1]

    cap = _vmem_capacity_bytes()
    vmem_limit = max(32 * _MiB, min(int(cap * 0.75), cap - 16 * _MiB))

    TP, per_batch_p = _plan_tiling(per_batch, Cin, C1, C2, C3, vmem_limit)
    T = per_batch_p // TP
    padded = per_batch_p != per_batch

    # Lane-dense bf16 slab: (B*T, Cin, TP) tiles, channels on sublanes, zero
    # padding on the point axis (masked out of BN stats / max in the kernel).
    g = grouped
    if padded:
        g = jnp.pad(g, ((0, 0), (0, per_batch_p - per_batch), (0, 0)))
    slab = jnp.transpose(g.reshape(B, T, TP, Cin), (0, 1, 3, 2))
    slab = slab.reshape(B * T, Cin, TP).astype(jnp.bfloat16)

    # Keep the whole slab VMEM-resident (single HBM read across all passes)
    # when 2x its size fits comfortably inside the scoped VMEM limit.
    slab_bytes = slab.size * 2
    x_resident = (2 * slab_bytes) <= int(0.4 * vmem_limit)

    # --- analytic training-mode BN stats for layer 1 (drops a whole sweep) ---
    # mean1 = W1 mu_x,  var1 = diag(W1 E[x x^T] W1^T) - mean1^2   (bias cancels)
    n_valid = B * per_batch
    w1f = w1.T.astype(jnp.float32)                                 # (C1, Cin)
    sum_x = jnp.sum(slab, axis=(0, 2), dtype=jnp.float32)          # pads are 0
    mean_x = sum_x / n_valid
    xxt = jnp.einsum("ncp,ndp->cd", slab, slab,
                     preferred_element_type=jnp.float32) / n_valid
    mean1 = w1f @ mean_x
    second1 = jnp.sum((w1f @ xxt) * w1f, axis=1)
    var1 = jnp.maximum(second1 - mean1 * mean1, 0.0)
    scale1 = g1 * lax.rsqrt(var1 + _BN_EPS)
    shift1 = be1 - mean1 * scale1

    def col(v):  # per-channel vector -> (C, 1) f32, broadcasts over lanes
        return jnp.asarray(v, jnp.float32).reshape(-1, 1)

    args = [slab,
            w1.T.astype(jnp.bfloat16), col(scale1), col(shift1),
            w2.T.astype(jnp.bfloat16), col(g2), col(be2),
            w3.T.astype(jnp.bfloat16), col(g3), col(be3)]

    if x_resident:
        x_spec = pl.BlockSpec((B * T, Cin, TP), lambda p, b, t: (0, 0, 0))
    else:
        x_spec = pl.BlockSpec((1, Cin, TP), lambda p, b, t: (b * T + t, 0, 0))
    const = lambda a: pl.BlockSpec(a.shape, lambda p, b, t: (0,) * a.ndim)
    in_specs = [x_spec] + [const(a) for a in args[1:]]
    out_spec = pl.BlockSpec((C3, B), lambda p, b, t: (0, 0))   # resident accum

    grid_spec = pltpu.PrefetchScalarGridSpec(
        num_scalar_prefetch=0,
        grid=(_NPASS, B, T),
        in_specs=in_specs,
        out_specs=out_spec,
        scratch_shapes=[pltpu.VMEM((C2, 1), jnp.float32),
                        pltpu.VMEM((C2, 1), jnp.float32),
                        pltpu.VMEM((C3, 1), jnp.float32),
                        pltpu.VMEM((C3, 1), jnp.float32)])

    out_cb = pl.pallas_call(
        make_msg_scale_kernel(n_valid, TP, T, per_batch, padded, x_resident),
        grid_spec=grid_spec,
        out_shape=jax.ShapeDtypeStruct((C3, B), jnp.float32),
        compiler_params=pltpu.CompilerParams(
            # Passes are sequentially dependent and training BN statistics
            # couple every point, so no grid axis can be 'parallel' (megacore)
            # without changing semantics.
            dimension_semantics=("arbitrary", "arbitrary", "arbitrary"),
            vmem_limit_bytes=vmem_limit,
        ),
    )(*args)
    return out_cb.T                                            # (B, C3)


# --------------------------------------------------------------------------
# Plain-JAX glue: furthest point sampling, ball query, grouping
# --------------------------------------------------------------------------
def furthest_point_sample(xyz, npoint):
    """xyz: (B, N, 3) -> (B, npoint) int32 indices.  Starts at index 0."""
    B, N, _ = xyz.shape
    idxs = jnp.zeros((B, npoint), jnp.int32)
    dists = jnp.full((B, N), 1e10, jnp.float32)
    last = jnp.zeros((B,), jnp.int32)

    def body(i, carry):
        idxs, dists, last = carry
        last_xyz = jnp.take_along_axis(xyz, last[:, None, None], axis=1)  # (B,1,3)
        d = jnp.sum((xyz - last_xyz) ** 2, axis=-1)                       # (B,N)
        dists = jnp.minimum(dists, d)
        nxt = jnp.argmax(dists, axis=-1).astype(jnp.int32)
        idxs = idxs.at[:, i].set(nxt)
        return idxs, dists, nxt

    idxs, _, _ = lax.fori_loop(1, npoint, body, (idxs, dists, last))
    return idxs


def ball_query(radius, nsample, xyz, new_xyz):
    """Indices (B, S, nsample) of up to nsample pts within radius of each
    center; remaining slots filled with the first in-radius index (matches the
    pointnet2 CUDA ball_query).  Clamped so the gather is never OOB even if a
    neighborhood were empty."""
    B, N, _ = xyz.shape
    d2 = jnp.sum((new_xyz[:, :, None, :] - xyz[:, None, :, :]) ** 2, -1)  # (B,S,N)
    within = d2 < (radius * radius)
    key = jnp.where(within, jnp.arange(N, dtype=jnp.int32)[None, None, :], N)
    key_sorted = jnp.sort(key, axis=-1)[:, :, :nsample]
    first = jnp.minimum(key_sorted[:, :, :1], N - 1)
    idx = jnp.where(key_sorted < N, key_sorted, first)
    return idx.astype(jnp.int32)


def query_and_group(radius, nsample, xyz, new_xyz, features):
    """Returns (B, npoint*nsample, 3+C) float32 grouped features (centered xyz
    concatenated with point descriptors)."""
    idx = ball_query(radius, nsample, xyz, new_xyz)                  # (B,S,K)
    grouped_xyz = jax.vmap(lambda pts, ind: pts[ind])(xyz, idx)      # (B,S,K,3)
    grouped_xyz = grouped_xyz - new_xyz[:, :, None, :]
    grouped_feat = jax.vmap(lambda f, ind: f[ind])(features, idx)    # (B,S,K,C)
    grouped = jnp.concatenate([grouped_xyz, grouped_feat], axis=-1)  # (B,S,K,3+C)
    B, S, K, Cin = grouped.shape
    # TODO(synk): fuse this gather + center subtraction into the Pallas kernel
    # (scalar-prefetched idx + manual DMA gather) to skip the HBM round trip.
    return grouped.reshape(B, S * K, Cin)


# --------------------------------------------------------------------------
# Module-level forward
# --------------------------------------------------------------------------
def pointnet_sa_msg_forward(xyz, features, subsampler, radii, nsamples, mlps_params):
    B, N, _ = xyz.shape
    npoint = N // subsampler
    fps_idx = furthest_point_sample(xyz, npoint)
    new_xyz = jnp.take_along_axis(xyz, fps_idx[..., None], axis=1)  # (B, npoint, 3)

    feats = []
    # TODO(synk): on v7x, stack the per-scale MLPs into one pallas_call with a
    # leading 'parallel' scale axis so the second TensorCore is used.
    for radius, nsample, params in zip(radii, nsamples, mlps_params):
        grouped = query_and_group(radius, nsample, xyz, new_xyz, features)
        feats.append(run_scale_mlp(grouped, params))                 # (B, Cout)
    return new_xyz, jnp.concatenate(feats, axis=1)


# --------------------------------------------------------------------------
# Deterministic parameter init (synthetic; shapes from build_mlp)
# --------------------------------------------------------------------------
def init_mlp_params(key, channels):
    """channels = [Cin, C1, C2, C3]; 3 layers of (conv_w, conv_b, bn_gamma, bn_beta)."""
    params = []
    for i in range(3):
        cin, cout = channels[i], channels[i + 1]
        key, kw, kb = jax.random.split(key, 3)
        w = jax.random.normal(kw, (cin, cout), jnp.float32) * 0.1   # Conv2d 1x1 weight
        b = jax.random.normal(kb, (cout,), jnp.float32) * 0.01      # Conv bias (cancels in BN)
        g = jnp.ones((cout,), jnp.float32)                          # BN weight
        be = jnp.zeros((cout,), jnp.float32)                        # BN bias
        params.append((w, b, g, be))
    return params, key


if __name__ == "__main__":
    key = jax.random.PRNGKey(0)
    B, N, C = 2, 64, 4
    subsampler = 4
    radii = (0.2, 0.4)
    nsamples = (8, 16)
    mlp_specs = [[C, 16, 16, 32], [C, 16, 16, 32]]

    k_xyz, k_feat, k_params = jax.random.split(key, 3)
    xyz = jax.random.uniform(k_xyz, (B, N, 3), jnp.float32)
    features = jax.random.normal(k_feat, (B, N, C), jnp.float32)

    mlps_params = []
    kp = k_params
    for spec in mlp_specs:
        channels = [spec[0] + 3] + spec[1:]      # mlp_spec[0] += 3 (xyz channels)
        params, kp = init_mlp_params(kp, channels)
        mlps_params.append(params)

    fwd = jax.jit(functools.partial(pointnet_sa_msg_forward,
                                    subsampler=subsampler,
                                    radii=radii, nsamples=nsamples))
    new_xyz, new_features = fwd(xyz, features, mlps_params=mlps_params)
    jax.block_until_ready((new_xyz, new_features))

    assert new_xyz.shape == (B, N // subsampler, 3)
    assert new_features.shape == (B, sum(s[-1] for s in mlp_specs))
    assert bool(jnp.all(jnp.isfinite(new_xyz)))
    assert bool(jnp.all(jnp.isfinite(new_features)))
    print("KERNEL_OK")
</pallas_src>

<mosaic_0001>
module attributes {stable_mosaic.version = 11 : i64} {
  func.func @kernel(%arg0: i32, %arg1: i32, %arg2: i32, %arg3: memref<2x7x128xbf16, #tpu.memory_space<vmem>>, %arg4: memref<16x7xbf16, #tpu.memory_space<vmem>>, %arg5: memref<16x1xf32, #tpu.memory_space<vmem>>, %arg6: memref<16x1xf32, #tpu.memory_space<vmem>>, %arg7: memref<16x16xbf16, #tpu.memory_space<vmem>>, %arg8: memref<16x1xf32, #tpu.memory_space<vmem>>, %arg9: memref<16x1xf32, #tpu.memory_space<vmem>>, %arg10: memref<32x16xbf16, #tpu.memory_space<vmem>>, %arg11: memref<32x1xf32, #tpu.memory_space<vmem>>, %arg12: memref<32x1xf32, #tpu.memory_space<vmem>>, %arg13: memref<32x2xf32, #tpu.memory_space<vmem>>, %arg14: memref<16x1xf32, #tpu.memory_space<vmem>>, %arg15: memref<16x1xf32, #tpu.memory_space<vmem>>, %arg16: memref<32x1xf32, #tpu.memory_space<vmem>>, %arg17: memref<32x1xf32, #tpu.memory_space<vmem>>) attributes {dimension_semantics = [#tpu.dimension_semantics<arbitrary>, #tpu.dimension_semantics<arbitrary>, #tpu.dimension_semantics<arbitrary>], iteration_bounds = array<i64: 3, 2, 1>, scalar_prefetch = 0 : i64, scratch_operands = 4 : i64, tpu.core_type = #tpu.core_type<tc>, window_params = [{pipeline_mode = #tpu.pipeline_mode<synchronous>, transform_indices = @transform_0, window_bounds = array<i64: 2, 7, 128>}, {pipeline_mode = #tpu.pipeline_mode<synchronous>, transform_indices = @transform_1, window_bounds = array<i64: 16, 7>}, {pipeline_mode = #tpu.pipeline_mode<synchronous>, transform_indices = @transform_2, window_bounds = array<i64: 16, 1>}, {pipeline_mode = #tpu.pipeline_mode<synchronous>, transform_indices = @transform_3, window_bounds = array<i64: 16, 1>}, {pipeline_mode = #tpu.pipeline_mode<synchronous>, transform_indices = @transform_4, window_bounds = array<i64: 16, 16>}, {pipeline_mode = #tpu.pipeline_mode<synchronous>, transform_indices = @transform_5, window_bounds = array<i64: 16, 1>}, {pipeline_mode = #tpu.pipeline_mode<synchronous>, transform_indices = @transform_6, window_bounds = array<i64: 16, 1>}, {pipeline_mode = #tpu.pipeline_mode<synchronous>, transform_indices = @transform_7, window_bounds = array<i64: 32, 16>}, {pipeline_mode = #tpu.pipeline_mode<synchronous>, transform_indices = @transform_8, window_bounds = array<i64: 32, 1>}, {pipeline_mode = #tpu.pipeline_mode<synchronous>, transform_indices = @transform_9, window_bounds = array<i64: 32, 1>}, {pipeline_mode = #tpu.pipeline_mode<synchronous>, transform_indices = @transform_10, window_bounds = array<i64: 32, 2>}]} {
    %c0_i32 = arith.constant 0 : i32
    %0 = arith.cmpi eq, %arg1, %c0_i32 : i32
    %c0_i32_0 = arith.constant 0 : i32
    %1 = arith.cmpi eq, %arg2, %c0_i32_0 : i32
    %2 = arith.andi %0, %1 : i1
    %c1_i32 = arith.constant 1 : i32
    %3 = arith.muli %arg1, %c1_i32 : i32
    %4 = arith.addi %3, %arg2 : i32
    %5 = arith.index_cast %4 : i32 to index
    %c0 = arith.constant 0 : index
    %c0_1 = arith.constant 0 : index
    %6 = vector.load %arg3[%5, %c0, %c0_1] : memref<2x7x128xbf16, #tpu.memory_space<vmem>>, vector<1x7x128xbf16>
    %7 = vector.shape_cast %6 : vector<1x7x128xbf16> to vector<7x128xbf16>
    %c0_i32_2 = arith.constant 0 : i32
    %8 = arith.cmpi eq, %arg0, %c0_i32_2 : i32
    %9 = arith.extui %8 : i1 to i32
    %c0_i32_3 = arith.constant 0 : i32
    %10 = arith.cmpi ne, %9, %c0_i32_3 : i32
    scf.if %10 {
      %c0_7 = arith.constant 0 : index
      %c0_8 = arith.constant 0 : index
      %17 = vector.load %arg4[%c0_7, %c0_8] : memref<16x7xbf16, #tpu.memory_space<vmem>>, vector<16x7xbf16>
      %cst = arith.constant dense<0.000000e+00> : vector<16x128xf32>
      %18 = tpu.matmul %17, %7, %cst {dimension_numbers = #tpu.dot_dimension_numbers<[1], [0], [0], [1], [0, 0, 1, 1], [], []>} : vector<16x7xbf16>, vector<7x128xbf16>, vector<16x128xf32> -> vector<16x128xf32>
      %c0_9 = arith.constant 0 : index
      %c0_10 = arith.constant 0 : index
      %19 = vector.load %arg5[%c0_9, %c0_10] : memref<16x1xf32, #tpu.memory_space<vmem>>, vector<16x1xf32>
      %c0_11 = arith.constant 0 : index
      %c0_12 = arith.constant 0 : index
      %20 = vector.load %arg6[%c0_11, %c0_12] : memref<16x1xf32, #tpu.memory_space<vmem>>, vector<16x1xf32>
      %21 = vector.broadcast %19 : vector<16x1xf32> to vector<16x128xf32>
      %22 = arith.mulf %18, %21 : vector<16x128xf32>
      %23 = vector.broadcast %20 : vector<16x1xf32> to vector<16x128xf32>
      %24 = arith.addf %22, %23 : vector<16x128xf32>
      %cst_13 = arith.constant 0.000000e+00 : f32
      %25 = vector.broadcast %cst_13 : f32 to vector<16x128xf32>
      %26 = arith.maximumf %24, %25 : vector<16x128xf32>
      %c0_14 = arith.constant 0 : index
      %c0_15 = arith.constant 0 : index
      %27 = vector.load %arg7[%c0_14, %c0_15] : memref<16x16xbf16, #tpu.memory_space<vmem>>, vector<16x16xbf16>
      %28 = arith.truncf %26 : vector<16x128xf32> to vector<16x128xbf16>
      %cst_16 = arith.constant dense<0.000000e+00> : vector<16x128xf32>
      %29 = tpu.matmul %27, %28, %cst_16 {dimension_numbers = #tpu.dot_dimension_numbers<[1], [0], [0], [1], [0, 0, 1, 1], [], []>} : vector<16x16xbf16>, vector<16x128xbf16>, vector<16x128xf32> -> vector<16x128xf32>
      %30 = arith.extui %2 : i1 to i32
      %c0_i32_17 = arith.constant 0 : i32
      %31 = arith.cmpi ne, %30, %c0_i32_17 : i32
      scf.if %31 {
        %cst_28 = arith.constant 0.000000e+00 : f32
        %43 = vector.broadcast %cst_28 : f32 to vector<16x1xf32>
        %c0_29 = arith.constant 0 : index
        %c0_30 = arith.constant 0 : index
        %44 = vector.load %arg14[%c0_29, %c0_30] : memref<16x1xf32, #tpu.memory_space<vmem>>, vector<16x1xf32>
        tpu.vector_store %arg14[%c0_29, %c0_30], %43 {strides = array<i32>} : memref<16x1xf32, #tpu.memory_space<vmem>>, vector<16x1xf32>,
        %cst_31 = arith.constant 0.000000e+00 : f32
        %45 = vector.broadcast %cst_31 : f32 to vector<16x1xf32>
        %c0_32 = arith.constant 0 : index
        %c0_33 = arith.constant 0 : index
        %46 = vector.load %arg15[%c0_32, %c0_33] : memref<16x1xf32, #tpu.memory_space<vmem>>, vector<16x1xf32>
        tpu.vector_store %arg15[%c0_32, %c0_33], %45 {strides = array<i32>} : memref<16x1xf32, #tpu.memory_space<vmem>>, vector<16x1xf32>,
      } else {
      }
      %c0_18 = arith.constant 0 : index
      %c0_19 = arith.constant 0 : index
      %32 = vector.load %arg14[%c0_18, %c0_19] : memref<16x1xf32, #tpu.memory_space<vmem>>, vector<16x1xf32>
      %cst_20 = arith.constant dense<0.000000e+00> : vector<16xf32>
      %33 = vector.multi_reduction <add>, %29, %cst_20 [1] : vector<16x128xf32> to vector<16xf32>
      %34 = vector.shape_cast %33 : vector<16xf32> to vector<16x1xf32>
      %35 = arith.addf %32, %34 : vector<16x1xf32>
      %c0_21 = arith.constant 0 : index
      %c0_22 = arith.constant 0 : index
      %36 = vector.load %arg14[%c0_21, %c0_22] : memref<16x1xf32, #tpu.memory_space<vmem>>, vector<16x1xf32>
      tpu.vector_store %arg14[%c0_21, %c0_22], %35 {strides = array<i32>} : memref<16x1xf32, #tpu.memory_space<vmem>>, vector<16x1xf32>,
      %c0_23 = arith.constant 0 : index
      %c0_24 = arith.constant 0 : index
      %37 = vector.load %arg15[%c0_23, %c0_24] : memref<16x1xf32, #tpu.memory_space<vmem>>, vector<16x1xf32>
      %38 = arith.mulf %29, %29 : vector<16x128xf32>
      %cst_25 = arith.constant dense<0.000000e+00> : vector<16xf32>
      %39 = vector.multi_reduction <add>, %38, %cst_25 [1] : vector<16x128xf32> to vector<16xf32>
      %40 = vector.shape_cast %39 : vector<16xf32> to vector<16x1xf32>
      %41 = arith.addf %37, %40 : vector<16x1xf32>
      %c0_26 = arith.constant 0 : index
      %c0_27 = arith.constant 0 : index
      %42 = vector.load %arg15[%c0_26, %c0_27] : memref<16x1xf32, #tpu.memory_space<vmem>>, vector<16x1xf32>
      tpu.vector_store %arg15[%c0_26, %c0_27], %41 {strides = array<i32>} : memref<16x1xf32, #tpu.memory_space<vmem>>, vector<16x1xf32>,
    } else {
    }
    %c1_i32_4 = arith.constant 1 : i32
    %11 = arith.cmpi eq, %arg0, %c1_i32_4 : i32
    %12 = arith.extui %11 : i1 to i32
    %c0_i32_5 = arith.constant 0 : i32
    %13 = arith.cmpi ne, %12, %c0_i32_5 : i32
    scf.if %13 {
      %c0_7 = arith.constant 0 : index
      %c0_8 = arith.constant 0 : index
      %17 = vector.load %arg14[%c0_7, %c0_8] : memref<16x1xf32, #tpu.memory_space<vmem>>, vector<16x1xf32>
      %cst = arith.constant 3.906250e-03 : f32
      %18 = vector.broadcast %cst : f32 to vector<16x1xf32>
      %19 = arith.mulf %17, %18 : vector<16x1xf32>
      %c0_9 = arith.constant 0 : index
      %c0_10 = arith.constant 0 : index
      %20 = vector.load %arg15[%c0_9, %c0_10] : memref<16x1xf32, #tpu.memory_space<vmem>>, vector<16x1xf32>
      %cst_11 = arith.constant 3.906250e-03 : f32
      %21 = vector.broadcast %cst_11 : f32 to vector<16x1xf32>
      %22 = arith.mulf %20, %21 : vector<16x1xf32>
      %23 = arith.mulf %19, %19 : vector<16x1xf32>
      %24 = arith.subf %22, %23 : vector<16x1xf32>
      %cst_12 = arith.constant 0.000000e+00 : f32
      %25 = vector.broadcast %cst_12 : f32 to vector<16x1xf32>
      %26 = arith.maximumf %24, %25 : vector<16x1xf32>
      %c0_13 = arith.constant 0 : index
      %c0_14 = arith.constant 0 : index
      %27 = vector.load %arg8[%c0_13, %c0_14] : memref<16x1xf32, #tpu.memory_space<vmem>>, vector<16x1xf32>
      %cst_15 = arith.constant 9.99999974E-6 : f32
      %28 = vector.broadcast %cst_15 : f32 to vector<16x1xf32>
      %29 = arith.addf %26, %28 : vector<16x1xf32>
      %30 = math.rsqrt %29 : vector<16x1xf32>
      %31 = arith.mulf %27, %30 : vector<16x1xf32>
      %c0_16 = arith.constant 0 : index
      %c0_17 = arith.constant 0 : index
      %32 = vector.load %arg9[%c0_16, %c0_17] : memref<16x1xf32, #tpu.memory_space<vmem>>, vector<16x1xf32>
      %33 = arith.mulf %19, %31 : vector<16x1xf32>
      %34 = arith.subf %32, %33 : vector<16x1xf32>
      %c0_18 = arith.constant 0 : index
      %c0_19 = arith.constant 0 : index
      %35 = vector.load %arg4[%c0_18, %c0_19] : memref<16x7xbf16, #tpu.memory_space<vmem>>, vector<16x7xbf16>
      %cst_20 = arith.constant dense<0.000000e+00> : vector<16x128xf32>
      %36 = tpu.matmul %35, %7, %cst_20 {dimension_numbers = #tpu.dot_dimension_numbers<[1], [0], [0], [1], [0, 0, 1, 1], [], []>} : vector<16x7xbf16>, vector<7x128xbf16>, vector<16x128xf32> -> vector<16x128xf32>
      %c0_21 = arith.constant 0 : index
      %c0_22 = arith.constant 0 : index
      %37 = vector.load %arg5[%c0_21, %c0_22] : memref<16x1xf32, #tpu.memory_space<vmem>>, vector<16x1xf32>
      %c0_23 = arith.constant 0 : index
      %c0_24 = arith.constant 0 : index
      %38 = vector.load %arg6[%c0_23, %c0_24] : memref<16x1xf32, #tpu.memory_space<vmem>>, vector<16x1xf32>
      %39 = vector.broadcast %37 : vector<16x1xf32> to vector<16x128xf32>
      %40 = arith.mulf %36, %39 : vector<16x128xf32>
      %41 = vector.broadcast %38 : vector<16x1xf32> to vector<16x128xf32>
      %42 = arith.addf %40, %41 : vector<16x128xf32>
      %cst_25 = arith.constant 0.000000e+00 : f32
      %43 = vector.broadcast %cst_25 : f32 to vector<16x128xf32>
      %44 = arith.maximumf %42, %43 : vector<16x128xf32>
      %c0_26 = arith.constant 0 : index
      %c0_27 = arith.constant 0 : index
      %45 = vector.load %arg7[%c0_26, %c0_27] : memref<16x16xbf16, #tpu.memory_space<vmem>>, vector<16x16xbf16>
      %46 = arith.truncf %44 : vector<16x128xf32> to vector<16x128xbf16>
      %cst_28 = arith.constant dense<0.000000e+00> : vector<16x128xf32>
      %47 = tpu.matmul %45, %46, %cst_28 {dimension_numbers = #tpu.dot_dimension_numbers<[1], [0], [0], [1], [0, 0, 1, 1], [], []>} : vector<16x16xbf16>, vector<16x128xbf16>, vector<16x128xf32> -> vector<16x128xf32>
      %48 = vector.broadcast %31 : vector<16x1xf32> to vector<16x128xf32>
      %49 = arith.mulf %47, %48 : vector<16x128xf32>
      %50 = vector.broadcast %34 : vector<16x1xf32> to vector<16x128xf32>
      %51 = arith.addf %49, %50 : vector<16x128xf32>
      %cst_29 = arith.constant 0.000000e+00 : f32
      %52 = vector.broadcast %cst_29 : f32 to vector<16x128xf32>
      %53 = arith.maximumf %51, %52 : vector<16x128xf32>
      %c0_30 = arith.constant 0 : index
      %c0_31 = arith.constant 0 : index
      %54 = vector.load %arg10[%c0_30, %c0_31] : memref<32x16xbf16, #tpu.memory_space<vmem>>, vector<32x16xbf16>
      %55 = arith.truncf %53 : vector<16x128xf32> to vector<16x128xbf16>
      %cst_32 = arith.constant dense<0.000000e+00> : vector<32x128xf32>
      %56 = tpu.matmul %54, %55, %cst_32 {dimension_numbers = #tpu.dot_dimension_numbers<[1], [0], [0], [1], [0, 0, 1, 1], [], []>} : vector<32x16xbf16>, vector<16x128xbf16>, vector<32x128xf32> -> vector<32x128xf32>
      %57 = arith.extui %2 : i1 to i32
      %c0_i32_33 = arith.constant 0 : i32
      %58 = arith.cmpi ne, %57, %c0_i32_33 : i32
      scf.if %58 {
        %cst_44 = arith.constant 0.000000e+00 : f32
        %70 = vector.broadcast %cst_44 : f32 to vector<32x1xf32>
        %c0_45 = arith.constant 0 : index
        %c0_46 = arith.constant 0 : index
        %71 = vector.load %arg16[%c0_45, %c0_46] : memref<32x1xf32, #tpu.memory_space<vmem>>, vector<32x1xf32>
        tpu.vector_store %arg16[%c0_45, %c0_46], %70 {strides = array<i32>} : memref<32x1xf32, #tpu.memory_space<vmem>>, vector<32x1xf32>,
        %cst_47 = arith.constant 0.000000e+00 : f32
        %72 = vector.broadcast %cst_47 : f32 to vector<32x1xf32>
        %c0_48 = arith.constant 0 : index
        %c0_49 = arith.constant 0 : index
        %73 = vector.load %arg17[%c0_48, %c0_49] : memref<32x1xf32, #tpu.memory_space<vmem>>, vector<32x1xf32>
        tpu.vector_store %arg17[%c0_48, %c0_49], %72 {strides = array<i32>} : memref<32x1xf32, #tpu.memory_space<vmem>>, vector<32x1xf32>,
      } else {
      }
      %c0_34 = arith.constant 0 : index
      %c0_35 = arith.constant 0 : index
      %59 = vector.load %arg16[%c0_34, %c0_35] : memref<32x1xf32, #tpu.memory_space<vmem>>, vector<32x1xf32>
      %cst_36 = arith.constant dense<0.000000e+00> : vector<32xf32>
      %60 = vector.multi_reduction <add>, %56, %cst_36 [1] : vector<32x128xf32> to vector<32xf32>
      %61 = vector.shape_cast %60 : vector<32xf32> to vector<32x1xf32>
      %62 = arith.addf %59, %61 : vector<32x1xf32>
      %c0_37 = arith.constant 0 : index
      %c0_38 = arith.constant 0 : index
      %63 = vector.load %arg16[%c0_37, %c0_38] : memref<32x1xf32, #tpu.memory_space<vmem>>, vector<32x1xf32>
      tpu.vector_store %arg16[%c0_37, %c0_38], %62 {strides = array<i32>} : memref<32x1xf32, #tpu.memory_space<vmem>>, vector<32x1xf32>,
      %c0_39 = arith.constant 0 : index
      %c0_40 = arith.constant 0 : index
      %64 = vector.load %arg17[%c0_39, %c0_40] : memref<32x1xf32, #tpu.memory_space<vmem>>, vector<32x1xf32>
      %65 = arith.mulf %56, %56 : vector<32x128xf32>
      %cst_41 = arith.constant dense<0.000000e+00> : vector<32xf32>
      %66 = vector.multi_reduction <add>, %65, %cst_41 [1] : vector<32x128xf32> to vector<32xf32>
      %67 = vector.shape_cast %66 : vector<32xf32> to vector<32x1xf32>
      %68 = arith.addf %64, %67 : vector<32x1xf32>
      %c0_42 = arith.constant 0 : index
      %c0_43 = arith.constant 0 : index
      %69 = vector.load %arg17[%c0_42, %c0_43] : memref<32x1xf32, #tpu.memory_space<vmem>>, vector<32x1xf32>
      tpu.vector_store %arg17[%c0_42, %c0_43], %68 {strides = array<i32>} : memref<32x1xf32, #tpu.memory_space<vmem>>, vector<32x1xf32>,
    } else {
    }
    %c2_i32 = arith.constant 2 : i32
    %14 = arith.cmpi eq, %arg0, %c2_i32 : i32
    %15 = arith.extui %14 : i1 to i32
    %c0_i32_6 = arith.constant 0 : i32
    %16 = arith.cmpi ne, %15, %c0_i32_6 : i32
    scf.if %16 {
      %c0_7 = arith.constant 0 : index
      %c0_8 = arith.constant 0 : index
      %17 = vector.load %arg14[%c0_7, %c0_8] : memref<16x1xf32, #tpu.memory_space<vmem>>, vector<16x1xf32>
      %cst = arith.constant 3.906250e-03 : f32
      %18 = vector.broadcast %cst : f32 to vector<16x1xf32>
      %19 = arith.mulf %17, %18 : vector<16x1xf32>
      %c0_9 = arith.constant 0 : index
      %c0_10 = arith.constant 0 : index
      %20 = vector.load %arg15[%c0_9, %c0_10] : memref<16x1xf32, #tpu.memory_space<vmem>>, vector<16x1xf32>
      %cst_11 = arith.constant 3.906250e-03 : f32
      %21 = vector.broadcast %cst_11 : f32 to vector<16x1xf32>
      %22 = arith.mulf %20, %21 : vector<16x1xf32>
      %23 = arith.mulf %19, %19 : vector<16x1xf32>
      %24 = arith.subf %22, %23 : vector<16x1xf32>
      %cst_12 = arith.constant 0.000000e+00 : f32
      %25 = vector.broadcast %cst_12 : f32 to vector<16x1xf32>
      %26 = arith.maximumf %24, %25 : vector<16x1xf32>
      %c0_13 = arith.constant 0 : index
      %c0_14 = arith.constant 0 : index
      %27 = vector.load %arg8[%c0_13, %c0_14] : memref<16x1xf32, #tpu.memory_space<vmem>>, vector<16x1xf32>
      %cst_15 = arith.constant 9.99999974E-6 : f32
      %28 = vector.broadcast %cst_15 : f32 to vector<16x1xf32>
      %29 = arith.addf %26, %28 : vector<16x1xf32>
      %30 = math.rsqrt %29 : vector<16x1xf32>
      %31 = arith.mulf %27, %30 : vector<16x1xf32>
      %c0_16 = arith.constant 0 : index
      %c0_17 = arith.constant 0 : index
      %32 = vector.load %arg9[%c0_16, %c0_17] : memref<16x1xf32, #tpu.memory_space<vmem>>, vector<16x1xf32>
      %33 = arith.mulf %19, %31 : vector<16x1xf32>
      %34 = arith.subf %32, %33 : vector<16x1xf32>
      %c0_18 = arith.constant 0 : index
      %c0_19 = arith.constant 0 : index
      %35 = vector.load %arg16[%c0_18, %c0_19] : memref<32x1xf32, #tpu.memory_space<vmem>>, vector<32x1xf32>
      %cst_20 = arith.constant 3.906250e-03 : f32
      %36 = vector.broadcast %cst_20 : f32 to vector<32x1xf32>
      %37 = arith.mulf %35, %36 : vector<32x1xf32>
      %c0_21 = arith.constant 0 : index
      %c0_22 = arith.constant 0 : index
      %38 = vector.load %arg17[%c0_21, %c0_22] : memref<32x1xf32, #tpu.memory_space<vmem>>, vector<32x1xf32>
      %cst_23 = arith.constant 3.906250e-03 : f32
      %39 = vector.broadcast %cst_23 : f32 to vector<32x1xf32>
      %40 = arith.mulf %38, %39 : vector<32x1xf32>
      %41 = arith.mulf %37, %37 : vector<32x1xf32>
      %42 = arith.subf %40, %41 : vector<32x1xf32>
      %cst_24 = arith.constant 0.000000e+00 : f32
      %43 = vector.broadcast %cst_24 : f32 to vector<32x1xf32>
      %44 = arith.maximumf %42, %43 : vector<32x1xf32>
      %c0_25 = arith.constant 0 : index
      %c0_26 = arith.constant 0 : index
      %45 = vector.load %arg11[%c0_25, %c0_26] : memref<32x1xf32, #tpu.memory_space<vmem>>, vector<32x1xf32>
      %cst_27 = arith.constant 9.99999974E-6 : f32
      %46 = vector.broadcast %cst_27 : f32 to vector<32x1xf32>
      %47 = arith.addf %44, %46 : vector<32x1xf32>
      %48 = math.rsqrt %47 : vector<32x1xf32>
      %49 = arith.mulf %45, %48 : vector<32x1xf32>
      %c0_28 = arith.constant 0 : index
      %c0_29 = arith.constant 0 : index
      %50 = vector.load %arg12[%c0_28, %c0_29] : memref<32x1xf32, #tpu.memory_space<vmem>>, vector<32x1xf32>
      %51 = arith.mulf %37, %49 : vector<32x1xf32>
      %52 = arith.subf %50, %51 : vector<32x1xf32>
      %c0_30 = arith.constant 0 : index
      %c0_31 = arith.constant 0 : index
      %53 = vector.load %arg4[%c0_30, %c0_31] : memref<16x7xbf16, #tpu.memory_space<vmem>>, vector<16x7xbf16>
      %cst_32 = arith.constant dense<0.000000e+00> : vector<16x128xf32>
      %54 = tpu.matmul %53, %7, %cst_32 {dimension_numbers = #tpu.dot_dimension_numbers<[1], [0], [0], [1], [0, 0, 1, 1], [], []>} : vector<16x7xbf16>, vector<7x128xbf16>, vector<16x128xf32> -> vector<16x128xf32>
      %c0_33 = arith.constant 0 : index
      %c0_34 = arith.constant 0 : index
      %55 = vector.load %arg5[%c0_33, %c0_34] : memref<16x1xf32, #tpu.memory_space<vmem>>, vector<16x1xf32>
      %c0_35 = arith.constant 0 : index
      %c0_36 = arith.constant 0 : index
      %56 = vector.load %arg6[%c0_35, %c0_36] : memref<16x1xf32, #tpu.memory_space<vmem>>, vector<16x1xf32>
      %57 = vector.broadcast %55 : vector<16x1xf32> to vector<16x128xf32>
      %58 = arith.mulf %54, %57 : vector<16x128xf32>
      %59 = vector.broadcast %56 : vector<16x1xf32> to vector<16x128xf32>
      %60 = arith.addf %58, %59 : vector<16x128xf32>
      %cst_37 = arith.constant 0.000000e+00 : f32
      %61 = vector.broadcast %cst_37 : f32 to vector<16x128xf32>
      %62 = arith.maximumf %60, %61 : vector<16x128xf32>
      %c0_38 = arith.constant 0 : index
      %c0_39 = arith.constant 0 : index
      %63 = vector.load %arg7[%c0_38, %c0_39] : memref<16x16xbf16, #tpu.memory_space<vmem>>, vector<16x16xbf16>
      %64 = arith.truncf %62 : vector<16x128xf32> to vector<16x128xbf16>
      %cst_40 = arith.constant dense<0.000000e+00> : vector<16x128xf32>
      %65 = tpu.matmul %63, %64, %cst_40 {dimension_numbers = #tpu.dot_dimension_numbers<[1], [0], [0], [1], [0, 0, 1, 1], [], []>} : vector<16x16xbf16>, vector<16x128xbf16>, vector<16x128xf32> -> vector<16x128xf32>
      %66 = vector.broadcast %31 : vector<16x1xf32> to vector<16x128xf32>
      %67 = arith.mulf %65, %66 : vector<16x128xf32>
      %68 = vector.broadcast %34 : vector<16x1xf32> to vector<16x128xf32>
      %69 = arith.addf %67, %68 : vector<16x128xf32>
      %cst_41 = arith.constant 0.000000e+00 : f32
      %70 = vector.broadcast %cst_41 : f32 to vector<16x128xf32>
      %71 = arith.maximumf %69, %70 : vector<16x128xf32>
      %c0_42 = arith.constant 0 : index
      %c0_43 = arith.constant 0 : index
      %72 = vector.load %arg10[%c0_42, %c0_43] : memref<32x16xbf16, #tpu.memory_space<vmem>>, vector<32x16xbf16>
      %73 = arith.truncf %71 : vector<16x128xf32> to vector<16x128xbf16>
      %cst_44 = arith.constant dense<0.000000e+00> : vector<32x128xf32>
      %74 = tpu.matmul %72, %73, %cst_44 {dimension_numbers = #tpu.dot_dimension_numbers<[1], [0], [0], [1], [0, 0, 1, 1], [], []>} : vector<32x16xbf16>, vector<16x128xbf16>, vector<32x128xf32> -> vector<32x128xf32>
      %75 = vector.broadcast %49 : vector<32x1xf32> to vector<32x128xf32>
      %76 = arith.mulf %74, %75 : vector<32x128xf32>
      %77 = vector.broadcast %52 : vector<32x1xf32> to vector<32x128xf32>
      %78 = arith.addf %76, %77 : vector<32x128xf32>
      %cst_45 = arith.constant 0.000000e+00 : f32
      %79 = vector.broadcast %cst_45 : f32 to vector<32x128xf32>
      %80 = arith.maximumf %78, %79 : vector<32x128xf32>
      %cst_46 = arith.constant dense<0xFF800000> : vector<32xf32>
      %81 = vector.multi_reduction <maximumf>, %80, %cst_46 [1] : vector<32x128xf32> to vector<32xf32>
      %82 = vector.shape_cast %81 : vector<32xf32> to vector<32x1xf32>
      %83 = tpu.iota {dimensions = array<i32: 1>} : vector<32x2xi32>
      %c0_47 = arith.constant 0 : index
      %c0_48 = arith.constant 0 : index
      %84 = vector.load %arg13[%c0_47, %c0_48] : memref<32x2xf32, #tpu.memory_space<vmem>>, vector<32x2xf32>
      %85 = vector.broadcast %arg1 : i32 to vector<32x2xi32>
      %86 = arith.cmpi eq, %83, %85 : vector<32x2xi32>
      %c0_i32_49 = arith.constant 0 : i32
      %87 = arith.cmpi eq, %arg2, %c0_i32_49 : i32
      %88 = vector.broadcast %87 : i1 to vector<32x2xi1>
      %89 = arith.andi %86, %88 : vector<32x2xi1>
      %cst_50 = arith.constant 0xFF800000 : f32
      %90 = vector.broadcast %cst_50 : f32 to vector<32x2xf32>
      %91 = arith.select %89, %90, %84 : vector<32x2xi1>, vector<32x2xf32>
      %92 = vector.broadcast %arg1 : i32 to vector<32x2xi32>
      %93 = arith.cmpi eq, %83, %92 : vector<32x2xi32>
      %94 = vector.broadcast %82 : vector<32x1xf32> to vector<32x2xf32>
      %95 = arith.maximumf %91, %94 : vector<32x2xf32>
      %96 = arith.select %93, %95, %91 : vector<32x2xi1>, vector<32x2xf32>
      %c0_51 = arith.constant 0 : index
      %c0_52 = arith.constant 0 : index
      %97 = vector.load %arg13[%c0_51, %c0_52] : memref<32x2xf32, #tpu.memory_space<vmem>>, vector<32x2xf32>
      tpu.vector_store %arg13[%c0_51, %c0_52], %96 {strides = array<i32>} : memref<32x2xf32, #tpu.memory_space<vmem>>, vector<32x2xf32>,
    } else {
    }
    return
  }
  func.func @transform_0(%arg0: i32, %arg1: i32, %arg2: i32) -> (i32, i32, i32) {
    %c0_i32 = arith.constant 0 : i32
    %c0_i32_0 = arith.constant 0 : i32
    %c0_i32_1 = arith.constant 0 : i32
    %c0_i32_2 = arith.constant 0 : i32
    return %c0_i32, %c0_i32_0, %c0_i32_1 : i32, i32, i32
  }
  func.func @transform_1(%arg0: i32, %arg1: i32, %arg2: i32) -> (i32, i32) {
    %c0_i32 = arith.constant 0 : i32
    %c0_i32_0 = arith.constant 0 : i32
    %c0_i32_1 = arith.constant 0 : i32
    return %c0_i32, %c0_i32_0 : i32, i32
  }
  func.func @transform_2(%arg0: i32, %arg1: i32, %arg2: i32) -> (i32, i32) {
    %c0_i32 = arith.constant 0 : i32
    %c0_i32_0 = arith.constant 0 : i32
    %c0_i32_1 = arith.constant 0 : i32
    return %c0_i32, %c0_i32_0 : i32, i32
  }
  func.func @transform_3(%arg0: i32, %arg1: i32, %arg2: i32) -> (i32, i32) {
    %c0_i32 = arith.constant 0 : i32
    %c0_i32_0 = arith.constant 0 : i32
    %c0_i32_1 = arith.constant 0 : i32
    return %c0_i32, %c0_i32_0 : i32, i32
  }
  func.func @transform_4(%arg0: i32, %arg1: i32, %arg2: i32) -> (i32, i32) {
    %c0_i32 = arith.constant 0 : i32
    %c0_i32_0 = arith.constant 0 : i32
    %c0_i32_1 = arith.constant 0 : i32
    return %c0_i32, %c0_i32_0 : i32, i32
  }
  func.func @transform_5(%arg0: i32, %arg1: i32, %arg2: i32) -> (i32, i32) {
    %c0_i32 = arith.constant 0 : i32
    %c0_i32_0 = arith.constant 0 : i32
    %c0_i32_1 = arith.constant 0 : i32
    return %c0_i32, %c0_i32_0 : i32, i32
  }
  func.func @transform_6(%arg0: i32, %arg1: i32, %arg2: i32) -> (i32, i32) {
    %c0_i32 = arith.constant 0 : i32
    %c0_i32_0 = arith.constant 0 : i32
    %c0_i32_1 = arith.constant 0 : i32
    return %c0_i32, %c0_i32_0 : i32, i32
  }
  func.func @transform_7(%arg0: i32, %arg1: i32, %arg2: i32) -> (i32, i32) {
    %c0_i32 = arith.constant 0 : i32
    %c0_i32_0 = arith.constant 0 : i32
    %c0_i32_1 = arith.constant 0 : i32
    return %c0_i32, %c0_i32_0 : i32, i32
  }
  func.func @transform_8(%arg0: i32, %arg1: i32, %arg2: i32) -> (i32, i32) {
    %c0_i32 = arith.constant 0 : i32
    %c0_i32_0 = arith.constant 0 : i32
    %c0_i32_1 = arith.constant 0 : i32
    return %c0_i32, %c0_i32_0 : i32, i32
  }
  func.func @transform_9(%arg0: i32, %arg1: i32, %arg2: i32) -> (i32, i32) {
    %c0_i32 = arith.constant 0 : i32
    %c0_i32_0 = arith.constant 0 : i32
    %c0_i32_1 = arith.constant 0 : i32
    return %c0_i32, %c0_i32_0 : i32, i32
  }
  func.func @transform_10(%arg0: i32, %arg1: i32, %arg2: i32) -> (i32, i32) {
    %c0_i32 = arith.constant 0 : i32
    %c0_i32_0 = arith.constant 0 : i32
    %c0_i32_1 = arith.constant 0 : i32
    return %c0_i32, %c0_i32_0 : i32, i32
  }
}

module attributes {stable_mosaic.version = 11 : i64} {
  func.func @kernel(%arg0: i32, %arg1: i32, %arg2: i32, %arg3: memref<2x7x256xbf16, #tpu.memory_space<vmem>>, %arg4: memref<16x7xbf16, #tpu.memory_space<vmem>>, %arg5: memref<16x1xf32, #tpu.memory_space<vmem>>, %arg6: memref<16x1xf32, #tpu.memory_space<vmem>>, %arg7: memref<16x16xbf16, #tpu.memory_space<vmem>>, %arg8: memref<16x1xf32, #tpu.memory_space<vmem>>, %arg9: memref<16x1xf32, #tpu.memory_space<vmem>>, %arg10: memref<32x16xbf16, #tpu.memory_space<vmem>>, %arg11: memref<32x1xf32, #tpu.memory_space<vmem>>, %arg12: memref<32x1xf32, #tpu.memory_space<vmem>>, %arg13: memref<32x2xf32, #tpu.memory_space<vmem>>, %arg14: memref<16x1xf32, #tpu.memory_space<vmem>>, %arg15: memref<16x1xf32, #tpu.memory_space<vmem>>, %arg16: memref<32x1xf32, #tpu.memory_space<vmem>>, %arg17: memref<32x1xf32, #tpu.memory_space<vmem>>) attributes {dimension_semantics = [#tpu.dimension_semantics<arbitrary>, #tpu.dimension_semantics<arbitrary>, #tpu.dimension_semantics<arbitrary>], iteration_bounds = array<i64: 3, 2, 1>, scalar_prefetch = 0 : i64, scratch_operands = 4 : i64, tpu.core_type = #tpu.core_type<tc>, window_params = [{pipeline_mode = #tpu.pipeline_mode<synchronous>, transform_indices = @transform_0, window_bounds = array<i64: 2, 7, 256>}, {pipeline_mode = #tpu.pipeline_mode<synchronous>, transform_indices = @transform_1, window_bounds = array<i64: 16, 7>}, {pipeline_mode = #tpu.pipeline_mode<synchronous>, transform_indices = @transform_2, window_bounds = array<i64: 16, 1>}, {pipeline_mode = #tpu.pipeline_mode<synchronous>, transform_indices = @transform_3, window_bounds = array<i64: 16, 1>}, {pipeline_mode = #tpu.pipeline_mode<synchronous>, transform_indices = @transform_4, window_bounds = array<i64: 16, 16>}, {pipeline_mode = #tpu.pipeline_mode<synchronous>, transform_indices = @transform_5, window_bounds = array<i64: 16, 1>}, {pipeline_mode = #tpu.pipeline_mode<synchronous>, transform_indices = @transform_6, window_bounds = array<i64: 16, 1>}, {pipeline_mode = #tpu.pipeline_mode<synchronous>, transform_indices = @transform_7, window_bounds = array<i64: 32, 16>}, {pipeline_mode = #tpu.pipeline_mode<synchronous>, transform_indices = @transform_8, window_bounds = array<i64: 32, 1>}, {pipeline_mode = #tpu.pipeline_mode<synchronous>, transform_indices = @transform_9, window_bounds = array<i64: 32, 1>}, {pipeline_mode = #tpu.pipeline_mode<synchronous>, transform_indices = @transform_10, window_bounds = array<i64: 32, 2>}]} {
    %c0_i32 = arith.constant 0 : i32
    %0 = arith.cmpi eq, %arg1, %c0_i32 : i32
    %c0_i32_0 = arith.constant 0 : i32
    %1 = arith.cmpi eq, %arg2, %c0_i32_0 : i32
    %2 = arith.andi %0, %1 : i1
    %c1_i32 = arith.constant 1 : i32
    %3 = arith.muli %arg1, %c1_i32 : i32
    %4 = arith.addi %3, %arg2 : i32
    %5 = arith.index_cast %4 : i32 to index
    %c0 = arith.constant 0 : index
    %c0_1 = arith.constant 0 : index
    %6 = vector.load %arg3[%5, %c0, %c0_1] : memref<2x7x256xbf16, #tpu.memory_space<vmem>>, vector<1x7x256xbf16>
    %7 = vector.shape_cast %6 : vector<1x7x256xbf16> to vector<7x256xbf16>
    %c0_i32_2 = arith.constant 0 : i32
    %8 = arith.cmpi eq, %arg0, %c0_i32_2 : i32
    %9 = arith.extui %8 : i1 to i32
    %c0_i32_3 = arith.constant 0 : i32
    %10 = arith.cmpi ne, %9, %c0_i32_3 : i32
    scf.if %10 {
      %c0_7 = arith.constant 0 : index
      %c0_8 = arith.constant 0 : index
      %17 = vector.load %arg4[%c0_7, %c0_8] : memref<16x7xbf16, #tpu.memory_space<vmem>>, vector<16x7xbf16>
      %cst = arith.constant dense<0.000000e+00> : vector<16x256xf32>
      %18 = tpu.matmul %17, %7, %cst {dimension_numbers = #tpu.dot_dimension_numbers<[1], [0], [0], [1], [0, 0, 1, 1], [], []>} : vector<16x7xbf16>, vector<7x256xbf16>, vector<16x256xf32> -> vector<16x256xf32>
      %c0_9 = arith.constant 0 : index
      %c0_10 = arith.constant 0 : index
      %19 = vector.load %arg5[%c0_9, %c0_10] : memref<16x1xf32, #tpu.memory_space<vmem>>, vector<16x1xf32>
      %c0_11 = arith.constant 0 : index
      %c0_12 = arith.constant 0 : index
      %20 = vector.load %arg6[%c0_11, %c0_12] : memref<16x1xf32, #tpu.memory_space<vmem>>, vector<16x1xf32>
      %21 = vector.broadcast %19 : vector<16x1xf32> to vector<16x256xf32>
      %22 = arith.mulf %18, %21 : vector<16x256xf32>
      %23 = vector.broadcast %20 : vector<16x1xf32> to vector<16x256xf32>
      %24 = arith.addf %22, %23 : vector<16x256xf32>
      %cst_13 = arith.constant 0.000000e+00 : f32
      %25 = vector.broadcast %cst_13 : f32 to vector<16x256xf32>
      %26 = arith.maximumf %24, %25 : vector<16x256xf32>
      %c0_14 = arith.constant 0 : index
      %c0_15 = arith.constant 0 : index
      %27 = vector.load %arg7[%c0_14, %c0_15] : memref<16x16xbf16, #tpu.memory_space<vmem>>, vector<16x16xbf16>
      %28 = arith.truncf %26 : vector<16x256xf32> to vector<16x256xbf16>
      %cst_16 = arith.constant dense<0.000000e+00> : vector<16x256xf32>
      %29 = tpu.matmul %27, %28, %cst_16 {dimension_numbers = #tpu.dot_dimension_numbers<[1], [0], [0], [1], [0, 0, 1, 1], [], []>} : vector<16x16xbf16>, vector<16x256xbf16>, vector<16x256xf32> -> vector<16x256xf32>
      %30 = arith.extui %2 : i1 to i32
      %c0_i32_17 = arith.constant 0 : i32
      %31 = arith.cmpi ne, %30, %c0_i32_17 : i32
      scf.if %31 {
        %cst_28 = arith.constant 0.000000e+00 : f32
        %43 = vector.broadcast %cst_28 : f32 to vector<16x1xf32>
        %c0_29 = arith.constant 0 : index
        %c0_30 = arith.constant 0 : index
        %44 = vector.load %arg14[%c0_29, %c0_30] : memref<16x1xf32, #tpu.memory_space<vmem>>, vector<16x1xf32>
        tpu.vector_store %arg14[%c0_29, %c0_30], %43 {strides = array<i32>} : memref<16x1xf32, #tpu.memory_space<vmem>>, vector<16x1xf32>,
        %cst_31 = arith.constant 0.000000e+00 : f32
        %45 = vector.broadcast %cst_31 : f32 to vector<16x1xf32>
        %c0_32 = arith.constant 0 : index
        %c0_33 = arith.constant 0 : index
        %46 = vector.load %arg15[%c0_32, %c0_33] : memref<16x1xf32, #tpu.memory_space<vmem>>, vector<16x1xf32>
        tpu.vector_store %arg15[%c0_32, %c0_33], %45 {strides = array<i32>} : memref<16x1xf32, #tpu.memory_space<vmem>>, vector<16x1xf32>,
      } else {
      }
      %c0_18 = arith.constant 0 : index
      %c0_19 = arith.constant 0 : index
      %32 = vector.load %arg14[%c0_18, %c0_19] : memref<16x1xf32, #tpu.memory_space<vmem>>, vector<16x1xf32>
      %cst_20 = arith.constant dense<0.000000e+00> : vector<16xf32>
      %33 = vector.multi_reduction <add>, %29, %cst_20 [1] : vector<16x256xf32> to vector<16xf32>
      %34 = vector.shape_cast %33 : vector<16xf32> to vector<16x1xf32>
      %35 = arith.addf %32, %34 : vector<16x1xf32>
      %c0_21 = arith.constant 0 : index
      %c0_22 = arith.constant 0 : index
      %36 = vector.load %arg14[%c0_21, %c0_22] : memref<16x1xf32, #tpu.memory_space<vmem>>, vector<16x1xf32>
      tpu.vector_store %arg14[%c0_21, %c0_22], %35 {strides = array<i32>} : memref<16x1xf32, #tpu.memory_space<vmem>>, vector<16x1xf32>,
      %c0_23 = arith.constant 0 : index
      %c0_24 = arith.constant 0 : index
      %37 = vector.load %arg15[%c0_23, %c0_24] : memref<16x1xf32, #tpu.memory_space<vmem>>, vector<16x1xf32>
      %38 = arith.mulf %29, %29 : vector<16x256xf32>
      %cst_25 = arith.constant dense<0.000000e+00> : vector<16xf32>
      %39 = vector.multi_reduction <add>, %38, %cst_25 [1] : vector<16x256xf32> to vector<16xf32>
      %40 = vector.shape_cast %39 : vector<16xf32> to vector<16x1xf32>
      %41 = arith.addf %37, %40 : vector<16x1xf32>
      %c0_26 = arith.constant 0 : index
      %c0_27 = arith.constant 0 : index
      %42 = vector.load %arg15[%c0_26, %c0_27] : memref<16x1xf32, #tpu.memory_space<vmem>>, vector<16x1xf32>
      tpu.vector_store %arg15[%c0_26, %c0_27], %41 {strides = array<i32>} : memref<16x1xf32, #tpu.memory_space<vmem>>, vector<16x1xf32>,
    } else {
    }
    %c1_i32_4 = arith.constant 1 : i32
    %11 = arith.cmpi eq, %arg0, %c1_i32_4 : i32
    %12 = arith.extui %11 : i1 to i32
    %c0_i32_5 = arith.constant 0 : i32
    %13 = arith.cmpi ne, %12, %c0_i32_5 : i32
    scf.if %13 {
      %c0_7 = arith.constant 0 : index
      %c0_8 = arith.constant 0 : index
      %17 = vector.load %arg14[%c0_7, %c0_8] : memref<16x1xf32, #tpu.memory_space<vmem>>, vector<16x1xf32>
      %cst = arith.constant 0.001953125 : f32
      %18 = vector.broadcast %cst : f32 to vector<16x1xf32>
      %19 = arith.mulf %17, %18 : vector<16x1xf32>
      %c0_9 = arith.constant 0 : index
      %c0_10 = arith.constant 0 : index
      %20 = vector.load %arg15[%c0_9, %c0_10] : memref<16x1xf32, #tpu.memory_space<vmem>>, vector<16x1xf32>
      %cst_11 = arith.constant 0.001953125 : f32
      %21 = vector.broadcast %cst_11 : f32 to vector<16x1xf32>
      %22 = arith.mulf %20, %21 : vector<16x1xf32>
      %23 = arith.mulf %19, %19 : vector<16x1xf32>
      %24 = arith.subf %22, %23 : vector<16x1xf32>
      %cst_12 = arith.constant 0.000000e+00 : f32
      %25 = vector.broadcast %cst_12 : f32 to vector<16x1xf32>
      %26 = arith.maximumf %24, %25 : vector<16x1xf32>
      %c0_13 = arith.constant 0 : index
      %c0_14 = arith.constant 0 : index
      %27 = vector.load %arg8[%c0_13, %c0_14] : memref<16x1xf32, #tpu.memory_space<vmem>>, vector<16x1xf32>
      %cst_15 = arith.constant 9.99999974E-6 : f32
      %28 = vector.broadcast %cst_15 : f32 to vector<16x1xf32>
      %29 = arith.addf %26, %28 : vector<16x1xf32>
      %30 = math.rsqrt %29 : vector<16x1xf32>
      %31 = arith.mulf %27, %30 : vector<16x1xf32>
      %c0_16 = arith.constant 0 : index
      %c0_17 = arith.constant 0 : index
      %32 = vector.load %arg9[%c0_16, %c0_17] : memref<16x1xf32, #tpu.memory_space<vmem>>, vector<16x1xf32>
      %33 = arith.mulf %19, %31 : vector<16x1xf32>
      %34 = arith.subf %32, %33 : vector<16x1xf32>
      %c0_18 = arith.constant 0 : index
      %c0_19 = arith.constant 0 : index
      %35 = vector.load %arg4[%c0_18, %c0_19] : memref<16x7xbf16, #tpu.memory_space<vmem>>, vector<16x7xbf16>
      %cst_20 = arith.constant dense<0.000000e+00> : vector<16x256xf32>
      %36 = tpu.matmul %35, %7, %cst_20 {dimension_numbers = #tpu.dot_dimension_numbers<[1], [0], [0], [1], [0, 0, 1, 1], [], []>} : vector<16x7xbf16>, vector<7x256xbf16>, vector<16x256xf32> -> vector<16x256xf32>
      %c0_21 = arith.constant 0 : index
      %c0_22 = arith.constant 0 : index
      %37 = vector.load %arg5[%c0_21, %c0_22] : memref<16x1xf32, #tpu.memory_space<vmem>>, vector<16x1xf32>
      %c0_23 = arith.constant 0 : index
      %c0_24 = arith.constant 0 : index
      %38 = vector.load %arg6[%c0_23, %c0_24] : memref<16x1xf32, #tpu.memory_space<vmem>>, vector<16x1xf32>
      %39 = vector.broadcast %37 : vector<16x1xf32> to vector<16x256xf32>
      %40 = arith.mulf %36, %39 : vector<16x256xf32>
      %41 = vector.broadcast %38 : vector<16x1xf32> to vector<16x256xf32>
      %42 = arith.addf %40, %41 : vector<16x256xf32>
      %cst_25 = arith.constant 0.000000e+00 : f32
      %43 = vector.broadcast %cst_25 : f32 to vector<16x256xf32>
      %44 = arith.maximumf %42, %43 : vector<16x256xf32>
      %c0_26 = arith.constant 0 : index
      %c0_27 = arith.constant 0 : index
      %45 = vector.load %arg7[%c0_26, %c0_27] : memref<16x16xbf16, #tpu.memory_space<vmem>>, vector<16x16xbf16>
      %46 = arith.truncf %44 : vector<16x256xf32> to vector<16x256xbf16>
      %cst_28 = arith.constant dense<0.000000e+00> : vector<16x256xf32>
      %47 = tpu.matmul %45, %46, %cst_28 {dimension_numbers = #tpu.dot_dimension_numbers<[1], [0], [0], [1], [0, 0, 1, 1], [], []>} : vector<16x16xbf16>, vector<16x256xbf16>, vector<16x256xf32> -> vector<16x256xf32>
      %48 = vector.broadcast %31 : vector<16x1xf32> to vector<16x256xf32>
      %49 = arith.mulf %47, %48 : vector<16x256xf32>
      %50 = vector.broadcast %34 : vector<16x1xf32> to vector<16x256xf32>
      %51 = arith.addf %49, %50 : vector<16x256xf32>
      %cst_29 = arith.constant 0.000000e+00 : f32
      %52 = vector.broadcast %cst_29 : f32 to vector<16x256xf32>
      %53 = arith.maximumf %51, %52 : vector<16x256xf32>
      %c0_30 = arith.constant 0 : index
      %c0_31 = arith.constant 0 : index
      %54 = vector.load %arg10[%c0_30, %c0_31] : memref<32x16xbf16, #tpu.memory_space<vmem>>, vector<32x16xbf16>
      %55 = arith.truncf %53 : vector<16x256xf32> to vector<16x256xbf16>
      %cst_32 = arith.constant dense<0.000000e+00> : vector<32x256xf32>
      %56 = tpu.matmul %54, %55, %cst_32 {dimension_numbers = #tpu.dot_dimension_numbers<[1], [0], [0], [1], [0, 0, 1, 1], [], []>} : vector<32x16xbf16>, vector<16x256xbf16>, vector<32x256xf32> -> vector<32x256xf32>
      %57 = arith.extui %2 : i1 to i32
      %c0_i32_33 = arith.constant 0 : i32
      %58 = arith.cmpi ne, %57, %c0_i32_33 : i32
      scf.if %58 {
        %cst_44 = arith.constant 0.000000e+00 : f32
        %70 = vector.broadcast %cst_44 : f32 to vector<32x1xf32>
        %c0_45 = arith.constant 0 : index
        %c0_46 = arith.constant 0 : index
        %71 = vector.load %arg16[%c0_45, %c0_46] : memref<32x1xf32, #tpu.memory_space<vmem>>, vector<32x1xf32>
        tpu.vector_store %arg16[%c0_45, %c0_46], %70 {strides = array<i32>} : memref<32x1xf32, #tpu.memory_space<vmem>>, vector<32x1xf32>,
        %cst_47 = arith.constant 0.000000e+00 : f32
        %72 = vector.broadcast %cst_47 : f32 to vector<32x1xf32>
        %c0_48 = arith.constant 0 : index
        %c0_49 = arith.constant 0 : index
        %73 = vector.load %arg17[%c0_48, %c0_49] : memref<32x1xf32, #tpu.memory_space<vmem>>, vector<32x1xf32>
        tpu.vector_store %arg17[%c0_48, %c0_49], %72 {strides = array<i32>} : memref<32x1xf32, #tpu.memory_space<vmem>>, vector<32x1xf32>,
      } else {
      }
      %c0_34 = arith.constant 0 : index
      %c0_35 = arith.constant 0 : index
      %59 = vector.load %arg16[%c0_34, %c0_35] : memref<32x1xf32, #tpu.memory_space<vmem>>, vector<32x1xf32>
      %cst_36 = arith.constant dense<0.000000e+00> : vector<32xf32>
      %60 = vector.multi_reduction <add>, %56, %cst_36 [1] : vector<32x256xf32> to vector<32xf32>
      %61 = vector.shape_cast %60 : vector<32xf32> to vector<32x1xf32>
      %62 = arith.addf %59, %61 : vector<32x1xf32>
      %c0_37 = arith.constant 0 : index
      %c0_38 = arith.constant 0 : index
      %63 = vector.load %arg16[%c0_37, %c0_38] : memref<32x1xf32, #tpu.memory_space<vmem>>, vector<32x1xf32>
      tpu.vector_store %arg16[%c0_37, %c0_38], %62 {strides = array<i32>} : memref<32x1xf32, #tpu.memory_space<vmem>>, vector<32x1xf32>,
      %c0_39 = arith.constant 0 : index
      %c0_40 = arith.constant 0 : index
      %64 = vector.load %arg17[%c0_39, %c0_40] : memref<32x1xf32, #tpu.memory_space<vmem>>, vector<32x1xf32>
      %65 = arith.mulf %56, %56 : vector<32x256xf32>
      %cst_41 = arith.constant dense<0.000000e+00> : vector<32xf32>
      %66 = vector.multi_reduction <add>, %65, %cst_41 [1] : vector<32x256xf32> to vector<32xf32>
      %67 = vector.shape_cast %66 : vector<32xf32> to vector<32x1xf32>
      %68 = arith.addf %64, %67 : vector<32x1xf32>
      %c0_42 = arith.constant 0 : index
      %c0_43 = arith.constant 0 : index
      %69 = vector.load %arg17[%c0_42, %c0_43] : memref<32x1xf32, #tpu.memory_space<vmem>>, vector<32x1xf32>
      tpu.vector_store %arg17[%c0_42, %c0_43], %68 {strides = array<i32>} : memref<32x1xf32, #tpu.memory_space<vmem>>, vector<32x1xf32>,
    } else {
    }
    %c2_i32 = arith.constant 2 : i32
    %14 = arith.cmpi eq, %arg0, %c2_i32 : i32
    %15 = arith.extui %14 : i1 to i32
    %c0_i32_6 = arith.constant 0 : i32
    %16 = arith.cmpi ne, %15, %c0_i32_6 : i32
    scf.if %16 {
      %c0_7 = arith.constant 0 : index
      %c0_8 = arith.constant 0 : index
      %17 = vector.load %arg14[%c0_7, %c0_8] : memref<16x1xf32, #tpu.memory_space<vmem>>, vector<16x1xf32>
      %cst = arith.constant 0.001953125 : f32
      %18 = vector.broadcast %cst : f32 to vector<16x1xf32>
      %19 = arith.mulf %17, %18 : vector<16x1xf32>
      %c0_9 = arith.constant 0 : index
      %c0_10 = arith.constant 0 : index
      %20 = vector.load %arg15[%c0_9, %c0_10] : memref<16x1xf32, #tpu.memory_space<vmem>>, vector<16x1xf32>
      %cst_11 = arith.constant 0.001953125 : f32
      %21 = vector.broadcast %cst_11 : f32 to vector<16x1xf32>
      %22 = arith.mulf %20, %21 : vector<16x1xf32>
      %23 = arith.mulf %19, %19 : vector<16x1xf32>
      %24 = arith.subf %22, %23 : vector<16x1xf32>
      %cst_12 = arith.constant 0.000000e+00 : f32
      %25 = vector.broadcast %cst_12 : f32 to vector<16x1xf32>
      %26 = arith.maximumf %24, %25 : vector<16x1xf32>
      %c0_13 = arith.constant 0 : index
      %c0_14 = arith.constant 0 : index
      %27 = vector.load %arg8[%c0_13, %c0_14] : memref<16x1xf32, #tpu.memory_space<vmem>>, vector<16x1xf32>
      %cst_15 = arith.constant 9.99999974E-6 : f32
      %28 = vector.broadcast %cst_15 : f32 to vector<16x1xf32>
      %29 = arith.addf %26, %28 : vector<16x1xf32>
      %30 = math.rsqrt %29 : vector<16x1xf32>
      %31 = arith.mulf %27, %30 : vector<16x1xf32>
      %c0_16 = arith.constant 0 : index
      %c0_17 = arith.constant 0 : index
      %32 = vector.load %arg9[%c0_16, %c0_17] : memref<16x1xf32, #tpu.memory_space<vmem>>, vector<16x1xf32>
      %33 = arith.mulf %19, %31 : vector<16x1xf32>
      %34 = arith.subf %32, %33 : vector<16x1xf32>
      %c0_18 = arith.constant 0 : index
      %c0_19 = arith.constant 0 : index
      %35 = vector.load %arg16[%c0_18, %c0_19] : memref<32x1xf32, #tpu.memory_space<vmem>>, vector<32x1xf32>
      %cst_20 = arith.constant 0.001953125 : f32
      %36 = vector.broadcast %cst_20 : f32 to vector<32x1xf32>
      %37 = arith.mulf %35, %36 : vector<32x1xf32>
      %c0_21 = arith.constant 0 : index
      %c0_22 = arith.constant 0 : index
      %38 = vector.load %arg17[%c0_21, %c0_22] : memref<32x1xf32, #tpu.memory_space<vmem>>, vector<32x1xf32>
      %cst_23 = arith.constant 0.001953125 : f32
      %39 = vector.broadcast %cst_23 : f32 to vector<32x1xf32>
      %40 = arith.mulf %38, %39 : vector<32x1xf32>
      %41 = arith.mulf %37, %37 : vector<32x1xf32>
      %42 = arith.subf %40, %41 : vector<32x1xf32>
      %cst_24 = arith.constant 0.000000e+00 : f32
      %43 = vector.broadcast %cst_24 : f32 to vector<32x1xf32>
      %44 = arith.maximumf %42, %43 : vector<32x1xf32>
      %c0_25 = arith.constant 0 : index
      %c0_26 = arith.constant 0 : index
      %45 = vector.load %arg11[%c0_25, %c0_26] : memref<32x1xf32, #tpu.memory_space<vmem>>, vector<32x1xf32>
      %cst_27 = arith.constant 9.99999974E-6 : f32
      %46 = vector.broadcast %cst_27 : f32 to vector<32x1xf32>
      %47 = arith.addf %44, %46 : vector<32x1xf32>
      %48 = math.rsqrt %47 : vector<32x1xf32>
      %49 = arith.mulf %45, %48 : vector<32x1xf32>
      %c0_28 = arith.constant 0 : index
      %c0_29 = arith.constant 0 : index
      %50 = vector.load %arg12[%c0_28, %c0_29] : memref<32x1xf32, #tpu.memory_space<vmem>>, vector<32x1xf32>
      %51 = arith.mulf %37, %49 : vector<32x1xf32>
      %52 = arith.subf %50, %51 : vector<32x1xf32>
      %c0_30 = arith.constant 0 : index
      %c0_31 = arith.constant 0 : index
      %53 = vector.load %arg4[%c0_30, %c0_31] : memref<16x7xbf16, #tpu.memory_space<vmem>>, vector<16x7xbf16>
      %cst_32 = arith.constant dense<0.000000e+00> : vector<16x256xf32>
      %54 = tpu.matmul %53, %7, %cst_32 {dimension_numbers = #tpu.dot_dimension_numbers<[1], [0], [0], [1], [0, 0, 1, 1], [], []>} : vector<16x7xbf16>, vector<7x256xbf16>, vector<16x256xf32> -> vector<16x256xf32>
      %c0_33 = arith.constant 0 : index
      %c0_34 = arith.constant 0 : index
      %55 = vector.load %arg5[%c0_33, %c0_34] : memref<16x1xf32, #tpu.memory_space<vmem>>, vector<16x1xf32>
      %c0_35 = arith.constant 0 : index
      %c0_36 = arith.constant 0 : index
      %56 = vector.load %arg6[%c0_35, %c0_36] : memref<16x1xf32, #tpu.memory_space<vmem>>, vector<16x1xf32>
      %57 = vector.broadcast %55 : vector<16x1xf32> to vector<16x256xf32>
      %58 = arith.mulf %54, %57 : vector<16x256xf32>
      %59 = vector.broadcast %56 : vector<16x1xf32> to vector<16x256xf32>
      %60 = arith.addf %58, %59 : vector<16x256xf32>
      %cst_37 = arith.constant 0.000000e+00 : f32
      %61 = vector.broadcast %cst_37 : f32 to vector<16x256xf32>
      %62 = arith.maximumf %60, %61 : vector<16x256xf32>
      %c0_38 = arith.constant 0 : index
      %c0_39 = arith.constant 0 : index
      %63 = vector.load %arg7[%c0_38, %c0_39] : memref<16x16xbf16, #tpu.memory_space<vmem>>, vector<16x16xbf16>
      %64 = arith.truncf %62 : vector<16x256xf32> to vector<16x256xbf16>
      %cst_40 = arith.constant dense<0.000000e+00> : vector<16x256xf32>
      %65 = tpu.matmul %63, %64, %cst_40 {dimension_numbers = #tpu.dot_dimension_numbers<[1], [0], [0], [1], [0, 0, 1, 1], [], []>} : vector<16x16xbf16>, vector<16x256xbf16>, vector<16x256xf32> -> vector<16x256xf32>
      %66 = vector.broadcast %31 : vector<16x1xf32> to vector<16x256xf32>
      %67 = arith.mulf %65, %66 : vector<16x256xf32>
      %68 = vector.broadcast %34 : vector<16x1xf32> to vector<16x256xf32>
      %69 = arith.addf %67, %68 : vector<16x256xf32>
      %cst_41 = arith.constant 0.000000e+00 : f32
      %70 = vector.broadcast %cst_41 : f32 to vector<16x256xf32>
      %71 = arith.maximumf %69, %70 : vector<16x256xf32>
      %c0_42 = arith.constant 0 : index
      %c0_43 = arith.constant 0 : index
      %72 = vector.load %arg10[%c0_42, %c0_43] : memref<32x16xbf16, #tpu.memory_space<vmem>>, vector<32x16xbf16>
      %73 = arith.truncf %71 : vector<16x256xf32> to vector<16x256xbf16>
      %cst_44 = arith.constant dense<0.000000e+00> : vector<32x256xf32>
      %74 = tpu.matmul %72, %73, %cst_44 {dimension_numbers = #tpu.dot_dimension_numbers<[1], [0], [0], [1], [0, 0, 1, 1], [], []>} : vector<32x16xbf16>, vector<16x256xbf16>, vector<32x256xf32> -> vector<32x256xf32>
      %75 = vector.broadcast %49 : vector<32x1xf32> to vector<32x256xf32>
      %76 = arith.mulf %74, %75 : vector<32x256xf32>
      %77 = vector.broadcast %52 : vector<32x1xf32> to vector<32x256xf32>
      %78 = arith.addf %76, %77 : vector<32x256xf32>
      %cst_45 = arith.constant 0.000000e+00 : f32
      %79 = vector.broadcast %cst_45 : f32 to vector<32x256xf32>
      %80 = arith.maximumf %78, %79 : vector<32x256xf32>
      %cst_46 = arith.constant dense<0xFF800000> : vector<32xf32>
      %81 = vector.multi_reduction <maximumf>, %80, %cst_46 [1] : vector<32x256xf32> to vector<32xf32>
      %82 = vector.shape_cast %81 : vector<32xf32> to vector<32x1xf32>
      %83 = tpu.iota {dimensions = array<i32: 1>} : vector<32x2xi32>
      %c0_47 = arith.constant 0 : index
      %c0_48 = arith.constant 0 : index
      %84 = vector.load %arg13[%c0_47, %c0_48] : memref<32x2xf32, #tpu.memory_space<vmem>>, vector<32x2xf32>
      %85 = vector.broadcast %arg1 : i32 to vector<32x2xi32>
      %86 = arith.cmpi eq, %83, %85 : vector<32x2xi32>
      %c0_i32_49 = arith.constant 0 : i32
      %87 = arith.cmpi eq, %arg2, %c0_i32_49 : i32
      %88 = vector.broadcast %87 : i1 to vector<32x2xi1>
      %89 = arith.andi %86, %88 : vector<32x2xi1>
      %cst_50 = arith.constant 0xFF800000 : f32
      %90 = vector.broadcast %cst_50 : f32 to vector<32x2xf32>
      %91 = arith.select %89, %90, %84 : vector<32x2xi1>, vector<32x2xf32>
      %92 = vector.broadcast %arg1 : i32 to vector<32x2xi32>
      %93 = arith.cmpi eq, %83, %92 : vector<32x2xi32>
      %94 = vector.broadcast %82 : vector<32x1xf32> to vector<32x2xf32>
      %95 = arith.maximumf %91, %94 : vector<32x2xf32>
      %96 = arith.select %93, %95, %91 : vector<32x2xi1>, vector<32x2xf32>
      %c0_51 = arith.constant 0 : index
      %c0_52 = arith.constant 0 : index
      %97 = vector.load %arg13[%c0_51, %c0_52] : memref<32x2xf32, #tpu.memory_space<vmem>>, vector<32x2xf32>
      tpu.vector_store %arg13[%c0_51, %c0_52], %96 {strides = array<i32>} : memref<32x2xf32, #tpu.memory_space<vmem>>, vector<32x2xf32>,
    } else {
    }
    return
  }
  func.func @transform_0(%arg0: i32, %arg1: i32, %arg2: i32) -> (i32, i32, i32) {
    %c0_i32 = arith.constant 0 : i32
    %c0_i32_0 = arith.constant 0 : i32
    %c0_i32_1 = arith.constant 0 : i32
    %c0_i32_2 = arith.constant 0 : i32
    return %c0_i32, %c0_i32_0, %c0_i32_1 : i32, i32, i32
  }
  func.func @transform_1(%arg0: i32, %arg1: i32, %arg2: i32) -> (i32, i32) {
    %c0_i32 = arith.constant 0 : i32
    %c0_i32_0 = arith.constant 0 : i32
    %c0_i32_1 = arith.constant 0 : i32
    return %c0_i32, %c0_i32_0 : i32, i32
  }
  func.func @transform_2(%arg0: i32, %arg1: i32, %arg2: i32) -> (i32, i32) {
    %c0_i32 = arith.constant 0 : i32
    %c0_i32_0 = arith.constant 0 : i32
    %c0_i32_1 = arith.constant 0 : i32
    return %c0_i32, %c0_i32_0 : i32, i32
  }
  func.func @transform_3(%arg0: i32, %arg1: i32, %arg2: i32) -> (i32, i32) {
    %c0_i32 = arith.constant 0 : i32
    %c0_i32_0 = arith.constant 0 : i32
    %c0_i32_1 = arith.constant 0 : i32
    return %c0_i32, %c0_i32_0 : i32, i32
  }
  func.func @transform_4(%arg0: i32, %arg1: i32, %arg2: i32) -> (i32, i32) {
    %c0_i32 = arith.constant 0 : i32
    %c0_i32_0 = arith.constant 0 : i32
    %c0_i32_1 = arith.constant 0 : i32
    return %c0_i32, %c0_i32_0 : i32, i32
  }
  func.func @transform_5(%arg0: i32, %arg1: i32, %arg2: i32) -> (i32, i32) {
    %c0_i32 = arith.constant 0 : i32
    %c0_i32_0 = arith.constant 0 : i32
    %c0_i32_1 = arith.constant 0 : i32
    return %c0_i32, %c0_i32_0 : i32, i32
  }
  func.func @transform_6(%arg0: i32, %arg1: i32, %arg2: i32) -> (i32, i32) {
    %c0_i32 = arith.constant 0 : i32
    %c0_i32_0 = arith.constant 0 : i32
    %c0_i32_1 = arith.constant 0 : i32
    return %c0_i32, %c0_i32_0 : i32, i32
  }
  func.func @transform_7(%arg0: i32, %arg1: i32, %arg2: i32) -> (i32, i32) {
    %c0_i32 = arith.constant 0 : i32
    %c0_i32_0 = arith.constant 0 : i32
    %c0_i32_1 = arith.constant 0 : i32
    return %c0_i32, %c0_i32_0 : i32, i32
  }
  func.func @transform_8(%arg0: i32, %arg1: i32, %arg2: i32) -> (i32, i32) {
    %c0_i32 = arith.constant 0 : i32
    %c0_i32_0 = arith.constant 0 : i32
    %c0_i32_1 = arith.constant 0 : i32
    return %c0_i32, %c0_i32_0 : i32, i32
  }
  func.func @transform_9(%arg0: i32, %arg1: i32, %arg2: i32) -> (i32, i32) {
    %c0_i32 = arith.constant 0 : i32
    %c0_i32_0 = arith.constant 0 : i32
    %c0_i32_1 = arith.constant 0 : i32
    return %c0_i32, %c0_i32_0 : i32, i32
  }
  func.func @transform_10(%arg0: i32, %arg1: i32, %arg2: i32) -> (i32, i32) {
    %c0_i32 = arith.constant 0 : i32
    %c0_i32_0 = arith.constant 0 : i32
    %c0_i32_1 = arith.constant 0 : i32
    return %c0_i32, %c0_i32_0 : i32, i32
  }
}

</mosaic_0001>

<bundles_post_ra>
// kernel: custom-call.12
= control target key start
LH: loop header
LB: loop body
LE: loop exit
PB: predicated region body
PF: predicated region fallthrough
CT: control target
= control target key end

     0   :  { %s6_s0 = inlined_call_operand.vmem [shape: f32[2,64], index: 0, kind: output, shape index: {}]  }

// kernel: pointnet_sa_msg_forward.2
= control target key start
LH: loop header
LB: loop body
LE: loop exit
PB: predicated region body
PF: predicated region fallthrough
CT: control target
= control target key end

     0   :  { %s1595_s13 = smov 0   ;;  %s1597_s14 = smov 0   ;;  %s1868_s0 = inlined_call_operand.vmem [shape: bf16[2,7,128], index: 0, kind: input, shape index: {}]   ;;  %s1869_s1 = inlined_call_operand.vmem [shape: bf16[16,7], index: 1, kind: input, shape index: {}]   ;;  %s1870_s2 = inlined_call_operand.vmem [shape: f32[16,1], index: 2, kind: input, shape index: {}]   ;;  %s1871_s3 = inlined_call_operand.vmem [shape: f32[16,1], index: 3, kind: input, shape index: {}]   ;;  %s1872_s4 = inlined_call_operand.vmem [shape: bf16[16,16], index: 4, kind: input, shape index: {}]   ;;  %s1873_s5 = inlined_call_operand.vmem [shape: f32[16,1], index: 5, kind: input, shape index: {}]   ;;  %s1874_s6 = inlined_call_operand.vmem [shape: f32[16,1], index: 6, kind: input, shape index: {}]   ;;  %s1875_s7 = inlined_call_operand.vmem [shape: bf16[32,16], index: 7, kind: input, shape index: {}]   ;;  %s1876_s8 = inlined_call_operand.vmem [shape: f32[32,1], index: 8, kind: input, shape index: {}]   ;;  %s1877_s9 = inlined_call_operand.vmem [shape: f32[32,1], index: 9, kind: input, shape index: {}]   ;;  %s1878_s10 = inlined_call_operand.vmem [shape: f32[32,2], index: 10, kind: output, shape index: {}]  }
   0x1   :  { %s1599_s15 = smov 0   ;;  %s1601_s16 = smov 0  }
   0x2   :  { %s1603_s17 = smov 0  }
   0x3 LB: > { %s35_s18 = sadd.s32 1, %s1516_s15  ;;  %s39_s19 = sadd.s32 1, %s1520_s16  ;;  %s1524_s17 = sphi %s1603_s17, %s20_s17   ;;  %s1520_s16 = sphi %s1601_s16, %s1884_s16   ;;  %s1516_s15 = sphi %s1599_s15, %s1883_s15   ;;  %s1512_s14 = sphi %s1597_s14, %s1882_s14   ;;  %s1508_s13 = sphi %s1595_s13, %s1881_s13  }
   0x4   : > { %p37_p0 = scmp.ge.s32.totalorder %s35_s18, 2  ;;  %p1305_p1 = scmp.ge.s32.totalorder %s1524_s17, 1 }
   0x5   : > { %p316_p2 = scmp.lt.s32.totalorder %s1524_s17, 7 }
   0x6   : > { %s1886_s18 = smov (%p37_p0, %s35_s18), 0  ;;  %s1888_s19 = smov (!%p37_p0, %s39_s19), %s1520_s16 }
   0x7   : > { %p317_p3 = pnand %p1305_p1, %p316_p2  ;;  %p41_p4 = scmp.ge.s32.totalorder %s1888_s19, 3 }
   0x8   : > { %p345_p5 = scmp.eq.s32.totalorder (!%p317_p3), %s1508_s13, 0  ;;  %s1307_s20 = sshll.u32 (!%p317_p3), %s1508_s13, 2 }
   0x9   : > { %s1890_s19 = smov (%p41_p4, %s1888_s19), 0  ;;  %320 = sbr.rel (%p317_p3) target bundleno = 2280 (0x8e8), region = 60 }
   0xa   : > { %s351_s23 = scalar_lea.vmem (!%p317_p3), %s1868_s0, %s1307_s20  ;;  %p1308_p6 = scmp.ne.s32.totalorder (!%p317_p3), %s1512_s14, 0 }
   0xb   : > { %v1634_v0 = vld [vmem:[%s351_s23] sm:$0xf] (!%p317_p3) }
  0x10   : > { %356 = sbr.rel (%p1308_p6) target bundleno = 615 (0x267), region = 64  ;;  %vm368_vm0 = vcmask (!%p1308_p6), 1042432   ;;  %vm369_vm1 = vcmask (!%p1308_p6), 1043456   ;;  %v1526_v1 = vmov (!%p1308_p6), 0.0   ;;  %v1527_v2 = vmov (!%p1308_p6), 65535   ;;  %v416_v5 = vld [vmem:[%s1870_s2] sm:$0xff] (!%p1308_p6) }
  0x11   : > { %1352 = vmatprep.subr.bf16.mxu0 (!%p1308_p6), %v1526_v1  ;;  %v370_v3 = vsel (!%p1308_p6), %vm368_vm0, 4294967295, %v1527_v2  ;;  %1358 = vmatprep.subr.bf16.mxu1 (!%p1308_p6), %v1526_v1  ;;  %vm1528_vm2 = vmmov (!%p1308_p6), 0   ;;  %v418_v6 = vld [vmem:[%s1871_s3] sm:$0xff] (!%p1308_p6)  ;;  %v1529_v8 = vmov (!%p1308_p6), 0   ;;  %vm364_vm3 = vcmask (!%p1308_p6), 56320   ;;  %v417_v10 = vld [vmem:[%s1870_s2 + $0x8] sm:$0xff] (!%p1308_p6) }
  0x12   : > { %v371_v4 = vsel (!%p1308_p6), %vm369_vm1, %v370_v3, 0  ;;  %1354 = vmatprep.mubr.msk.bf16.mxu0 (!%p1308_p6), %vm1528_vm2, %v1526_v1  ;;  %1360 = vmatprep.mubr.msk.bf16.mxu1 (!%p1308_p6), %vm1528_vm2, %v1526_v1  ;;  %v1456_v9 = vld [vmem:[%s1869_s1] sm:$0xff] (!%p1308_p6)   ;;  %v419_v11 = vld [vmem:[%s1871_s3 + $0x8] sm:$0xff] (!%p1308_p6)  ;;  %vm454_vm4 = vcmask (!%p1308_p6), 130048  }
  0x13   : > { %v373_v7 = vand.u32 (!%p1308_p6), %v371_v4, %v1634_v0  ;;  %1454 = vset.pattern.permute.xlu0 (!%p1308_p6), %v1529_v8  ;;  %1455 = vset.pattern.permute.xlu1 (!%p1308_p6), %v1529_v8  ;;  %v1457_v27 = vld [vmem:[%s1872_s4] sm:$0xff] (!%p1308_p6)  }
  0x14   : > { %422 = vperm.xlu0 (!%p1308_p6), %1454, %v416_v5   ;;  %434 = vperm.xlu1 (!%p1308_p6), %1455, %v418_v6  }
  0x15   : > { %1353 = vmatpush3.bf16.msra.mxu0 (!%p1308_p6), %v373_v7 }
  0x17   : > { %vm501_vm5 = vcmask (%p345_p5), 7168   ;;  %v1530_v32 = vmov (%p345_p5), 0.0  }
  0x18   : > { %1355 = vmatmul.mubr.msk.bf16.vlgmr.msra.gmra.mrb[0].mxu0 %vm364_vm3, %v1456_v9  ;;  %427 = vperm.xlu0 %1454, %v417_v10   ;;  %502 = vst.msk [vmem:[#allocation2] sm:$0xff] (%p345_p5), %vm501_vm5, %v1530_v32  ;;  %503 = vst.msk [vmem:[#allocation2 + $0x8] sm:$0xff] (%p345_p5), %vm501_vm5, %v1530_v32 }
  0x19   : > { %439 = vperm.xlu1 %1455, %v419_v11   ;;  %504 = vst.msk [vmem:[#allocation3] sm:$0xff] (%p345_p5), %vm501_vm5, %v1530_v32  ;;  %505 = vst.msk [vmem:[#allocation3 + $0x8] sm:$0xff] (%p345_p5), %vm501_vm5, %v1530_v32 }
  0x93   : > { %v423_v12 = vpop.permute.xlu0 %422  ;;  %v435_v13 = vpop.permute.xlu1 %434 }
  0x97   : > { %v428_v17 = vpop.permute.xlu0 %427 }
  0x98   : > { %v440_v22 = vpop.permute.xlu1 %439 }
  0xeb   : > { %v409_v14 = vpop.f32.mrb[0].mxu0 }
  0xec   : > { %v430_v15 = vmul.f32 %v423_v12, %v409_v14  ;;  %v1356_v16 = vpop.f32.mrb[1].mxu0 }
  0xed   : > { %v412_v18 = vpop.f32.mrb[2].mxu0 }
  0xee   : > { %v442_v19 = vadd.f32 %v435_v13, %v430_v15  ;;  %v431_v20 = vmul.f32 %v428_v17, %v412_v18  ;;  %v1357_v21 = vpop.f32.mrb[3].mxu0 }
  0xf0   : > { %v443_v23 = vadd.f32 %v440_v22, %v431_v20  ;;  %v444_v24 = vmax.f32 %v442_v19, 0.0 }
  0xf2   : > { %v445_v25 = vmax.f32 %v443_v23, 0.0 }
  0xf4   : > { %v448_v26 = vpack.c.bf16 %v445_v25, %v444_v24 }
  0xf6   : > { %1359 = vmatpush3.bf16.msra.mxu1 %v448_v26 }
  0xf9   : > { %1361 = vmatmul.mubr.msk.bf16.vlgmr.msra.gmra.mrb[0].mxu1 %vm454_vm4, %v1457_v27 }
 0x1c9   : > { %500 = sbr.rel (!%p345_p5) target bundleno = 464 (0x1d0), region = 68 }
 0x1cc   : > { %v492_v28 = vpop.f32.mrb[0].mxu1 }
 0x1cd   : > { %v1362_v29 = vpop.f32.mrb[1].mxu1 }
 0x1ce   : > { %v495_v30 = vpop.f32.mrb[2].mxu1 }
 0x1cf   : > { %v1363_v31 = vpop.f32.mrb[3].mxu1 }
 0x1d0 PF: > { %508 = vadd.xlane.f32.xlu0 %v492_v28  ;;  %v519_v33 = vmul.f32 %v492_v28, %v492_v28  ;;  %v520_v34 = vmul.f32 %v495_v30, %v495_v30  ;;  %v506_v35 = vld [vmem:[#allocation2] sm:$0xff]  ;;  %vm514_vm6 = vcmask 7168   ;;  %v517_v37 = vld [vmem:[#allocation3] sm:$0xff]  ;;  %v507_v40 = vld [vmem:[#allocation2 + $0x8] sm:$0xff] }
 0x1d1   : > { %v518_v43 = vld [vmem:[#allocation3 + $0x8] sm:$0xff] }
 0x1d2   : > { %521 = vadd.xlane.f32.xlu1 %v519_v33 }
 0x1d4   : > { %510 = vadd.xlane.f32.xlu0 %v495_v30 }
 0x1d6   : > { %523 = vadd.xlane.f32.xlu1 %v520_v34 }
 0x25d   : > { %v509_v36 = vpop.xlane.xlu0 %508 }
 0x25e   : > { %v512_v38 = vadd.f32 %v509_v36, %v506_v35 }
 0x25f   : > { %v522_v39 = vpop.xlane.xlu1 %521 }
 0x260   : > { %515 = vst.msk [vmem:[#allocation2] sm:$0xff] %vm514_vm6, %v512_v38  ;;  %v525_v41 = vadd.f32 %v522_v39, %v517_v37 }
 0x261   : > { %v511_v42 = vpop.xlane.xlu0 %510 }
 0x262   : > { %527 = vst.msk [vmem:[#allocation3] sm:$0xff] %vm514_vm6, %v525_v41  ;;  %v513_v44 = vadd.f32 %v511_v42, %v507_v40 }
 0x263   : > { %v524_v45 = vpop.xlane.xlu1 %523 }
 0x264   : > { %516 = vst.msk [vmem:[#allocation2 + $0x8] sm:$0xff] %vm514_vm6, %v513_v44  ;;  %v526_v46 = vadd.f32 %v524_v45, %v518_v43 }
 0x266   : > { %528 = vst.msk [vmem:[#allocation3 + $0x8] sm:$0xff] %vm514_vm6, %v526_v46 }
 0x267 PF: > { %p1313_p7 = scmp.ne.s32.totalorder %s1512_s14, 1 }
 0x268   : > { %vm572_vm7 = vcmask (!%p1313_p7), 1042432   ;;  %vm573_vm8 = vcmask (!%p1313_p7), 1043456   ;;  %v1531_v47 = vmov (!%p1313_p7), 0.0   ;;  %v1532_v48 = vmov (!%p1313_p7), 65535   ;;  %v620_v51 = vld [vmem:[%s1870_s2] sm:$0xff] (!%p1313_p7)  ;;  %v621_v62 = vld [vmem:[%s1870_s2 + $0x8] sm:$0xff] (!%p1313_p7) }
 0x269   : > { %532 = sbr.rel (%p1313_p7) target bundleno = 1447 (0x5a7), region = 72  ;;  %1364 = vmatprep.subr.bf16.mxu0 (!%p1313_p7), %v1531_v47  ;;  %v574_v49 = vsel (!%p1313_p7), %vm572_vm7, 4294967295, %v1532_v48  ;;  %1370 = vmatprep.subr.bf16.mxu1 (!%p1313_p7), %v1531_v47  ;;  %vm1533_vm9 = vmmov (!%p1313_p7), 0   ;;  %v622_v52 = vld [vmem:[%s1871_s3] sm:$0xff] (!%p1313_p7)  ;;  %v1534_v54 = vmov (!%p1313_p7), 0   ;;  %v537_v56 = vld [vmem:[#allocation3] sm:$0xff] (!%p1313_p7) }
 0x26a   : > { %v575_v50 = vsel (!%p1313_p7), %vm573_vm8, %v574_v49, 0  ;;  %1366 = vmatprep.mubr.msk.bf16.mxu0 (!%p1313_p7), %vm1533_vm9, %v1531_v47  ;;  %1372 = vmatprep.mubr.msk.bf16.mxu1 (!%p1313_p7), %vm1533_vm9, %v1531_v47  ;;  %v533_v55 = vld [vmem:[#allocation2] sm:$0xff] (!%p1313_p7)  ;;  %v539_v59 = vmul.f32 (!%p1313_p7), 0.00390625, %v537_v56  ;;  %vm568_vm10 = vcmask (!%p1313_p7), 56320   ;;  %v623_v63 = vld [vmem:[%s1871_s3 + $0x8] sm:$0xff] (!%p1313_p7)  ;;  %vm658_vm11 = vcmask (!%p1313_p7), 130048  }
 0x26b   : > { %v577_v53 = vand.u32 (!%p1313_p7), %v575_v50, %v1634_v0  ;;  %1458 = vset.pattern.permute.xlu0 (!%p1313_p7), %v1534_v54  ;;  %1459 = vset.pattern.permute.xlu1 (!%p1313_p7), %v1534_v54  ;;  %v1460_v57 = vld [vmem:[%s1869_s1] sm:$0xff] (!%p1313_p7)   ;;  %v535_v58 = vmul.f32 (!%p1313_p7), 0.00390625, %v533_v55  ;;  %v534_v60 = vld [vmem:[#allocation2 + $0x8] sm:$0xff] (!%p1313_p7) }
 0x26c   : > { %626 = vperm.xlu0 (!%p1313_p7), %1458, %v620_v51   ;;  %638 = vperm.xlu1 (!%p1313_p7), %1459, %v622_v52   ;;  %v536_v1 = vmul.f32 (!%p1313_p7), 0.00390625, %v534_v60  ;;  %v547_v11 = vld [vmem:[%s1873_s5] sm:$0xff] (!%p1313_p7)  ;;  %v548_v12 = vld [vmem:[%s1873_s5 + $0x8] sm:$0xff] (!%p1313_p7) }
 0x26d   : > { %v538_v61 = vld [vmem:[#allocation3 + $0x8] sm:$0xff] (!%p1313_p7)  ;;  %1365 = vmatpush3.bf16.msra.mxu0 (!%p1313_p7), %v577_v53  ;;  %v541_v3 = vmul.f32 (!%p1313_p7), %v535_v58, %v535_v58  ;;  %v555_v17 = vld [vmem:[%s1874_s6] sm:$0xff] (!%p1313_p7)  ;;  %v556_v19 = vld [vmem:[%s1874_s6 + $0x8] sm:$0xff] (!%p1313_p7) }
 0x26e   : > { %v540_v2 = vmul.f32 (!%p1313_p7), 0.00390625, %v538_v61  ;;  %v542_v4 = vmul.f32 (!%p1313_p7), %v536_v1, %v536_v1  ;;  %v1461_v38 = vld [vmem:[%s1872_s4] sm:$0xff] (!%p1313_p7)   ;;  %v1463_v55 = vld [vmem:[%s1875_s7 + $0x8] sm:$0xff] (!%p1313_p7)  }
 0x26f   : > { %v543_v5 = vsub.f32 (!%p1313_p7), %v539_v59, %v541_v3  ;;  %v1462_v39 = vld [vmem:[%s1875_s7] sm:$0xff] (!%p1313_p7)  }
 0x270   : > { %1367 = vmatmul.mubr.msk.bf16.vlgmr.msra.gmra.mrb[0].mxu0 %vm568_vm10, %v1460_v57  ;;  %631 = vperm.xlu0 %1458, %v621_v62   ;;  %v544_v6 = vsub.f32 %v540_v2, %v542_v4  ;;  %vm801_vm12 = vcmask (%p345_p5), 7168   ;;  %v1535_v60 = vmov (%p345_p5), 0.0  }
 0x271   : > { %643 = vperm.xlu1 %1459, %v623_v63   ;;  %v545_v7 = vmax.f32 %v543_v5, 0.0  ;;  %1378 = vmatprep.mubr.msk.bf16.mxu0 %vm658_vm11, %v1462_v39  ;;  %802 = vst.msk [vmem:[#allocation4] sm:$0xff] (%p345_p5), %vm801_vm12, %v1535_v60  ;;  %803 = vst.msk [vmem:[#allocation4 + $0x8] sm:$0xff] (%p345_p5), %vm801_vm12, %v1535_v60 }
 0x272   : > { %v546_v8 = vmax.f32 %v544_v6, 0.0  ;;  %804 = vst.msk [vmem:[#allocation4 + $0x10] sm:$0xff] (%p345_p5), %vm801_vm12, %v1535_v60  ;;  %805 = vst.msk [vmem:[#allocation4 + $0x18] sm:$0xff] (%p345_p5), %vm801_vm12, %v1535_v60 }
 0x273   : > { %v549_v9 = vadd.f32 1e-05, %v545_v7  ;;  %806 = vst.msk [vmem:[#allocation5] sm:$0xff] (%p345_p5), %vm801_vm12, %v1535_v60  ;;  %807 = vst.msk [vmem:[#allocation5 + $0x8] sm:$0xff] (%p345_p5), %vm801_vm12, %v1535_v60 }
 0x274   : > { %v550_v10 = vadd.f32 1e-05, %v546_v8  ;;  %808 = vst.msk [vmem:[#allocation5 + $0x10] sm:$0xff] (%p345_p5), %vm801_vm12, %v1535_v60  ;;  %809 = vst.msk [vmem:[#allocation5 + $0x18] sm:$0xff] (%p345_p5), %vm801_vm12, %v1535_v60 }
 0x275   : > { %1464 = vrsqrt.f32 %v549_v9 }
 0x276   : > { %1466 = vrsqrt.f32 %v550_v10 }
 0x27f   : > { %v1465_v13 = vpop.eup %1464 }
 0x280   : > { %v1467_v14 = vpop.eup %1466  ;;  %v553_v15 = vmul.f32 %v1465_v13, %v547_v11 }
 0x281   : > { %v554_v16 = vmul.f32 %v1467_v14, %v548_v12 }
 0x282   : > { %705 = vperm.xlu0 %1458, %v553_v15   ;;  %v557_v18 = vmul.f32 %v553_v15, %v535_v58 }
 0x283   : > { %710 = vperm.xlu1 %1459, %v554_v16   ;;  %v558_v20 = vmul.f32 %v554_v16, %v536_v1 }
 0x284   : > { %v559_v21 = vsub.f32 %v555_v17, %v557_v18 }
 0x285   : > { %v560_v22 = vsub.f32 %v556_v19, %v558_v20 }
 0x286   : > { %717 = vperm.xlu0 %1458, %v559_v21  }
 0x287   : > { %722 = vperm.xlu1 %1459, %v560_v22  }
 0x2eb   : > { %v627_v23 = vpop.permute.xlu0 %626  ;;  %v639_v24 = vpop.permute.xlu1 %638 }
 0x2ef   : > { %v632_v28 = vpop.permute.xlu0 %631 }
 0x2f0   : > { %v644_v33 = vpop.permute.xlu1 %643 }
 0x301   : > { %v706_v40 = vpop.permute.xlu0 %705 }
 0x302   : > { %v711_v41 = vpop.permute.xlu1 %710 }
 0x305   : > { %v718_v45 = vpop.permute.xlu0 %717 }
 0x306   : > { %v723_v50 = vpop.permute.xlu1 %722 }
 0x343   : > { %v613_v25 = vpop.f32.mrb[0].mxu0 }
 0x344   : > { %v634_v26 = vmul.f32 %v627_v23, %v613_v25  ;;  %v1368_v27 = vpop.f32.mrb[1].mxu0 }
 0x345   : > { %v616_v29 = vpop.f32.mrb[2].mxu0 }
 0x346   : > { %v646_v30 = vadd.f32 %v639_v24, %v634_v26  ;;  %v635_v31 = vmul.f32 %v632_v28, %v616_v29  ;;  %v1369_v32 = vpop.f32.mrb[3].mxu0 }
 0x348   : > { %v647_v34 = vadd.f32 %v644_v33, %v635_v31  ;;  %v648_v35 = vmax.f32 %v646_v30, 0.0 }
 0x34a   : > { %v649_v36 = vmax.f32 %v647_v34, 0.0 }
 0x34c   : > { %v652_v37 = vpack.c.bf16 %v649_v36, %v648_v35 }
 0x34e   : > { %1371 = vmatpush3.bf16.msra.mxu1 %v652_v37 }
 0x351   : > { %1373 = vmatmul.mubr.msk.bf16.vlgmr.msra.gmra.mrb[0].mxu1 %vm658_vm11, %v1461_v38 }
 0x424   : > { %v696_v42 = vpop.f32.mrb[0].mxu1 }
 0x425   : > { %v713_v43 = vmul.f32 %v706_v40, %v696_v42  ;;  %v1374_v44 = vpop.f32.mrb[1].mxu1 }
 0x426   : > { %v699_v46 = vpop.f32.mrb[2].mxu1 }
 0x427   : > { %v725_v47 = vadd.f32 %v718_v45, %v713_v43  ;;  %v714_v48 = vmul.f32 %v711_v41, %v699_v46  ;;  %v1375_v49 = vpop.f32.mrb[3].mxu1 }
 0x429   : > { %v726_v51 = vadd.f32 %v723_v50, %v714_v48  ;;  %v727_v52 = vmax.f32 %v725_v47, 0.0 }
 0x42b   : > { %v728_v53 = vmax.f32 %v726_v51, 0.0 }
 0x42d   : > { %v733_v54 = vpack.c.bf16 %v728_v53, %v727_v52 }
 0x42f   : > { %1376 = vmatprep.subr.bf16.mxu0 %v733_v54 }
 0x430   : > { %1377 = vmatpush3.bf16.msra.mxu0 %v733_v54 }
 0x433   : > { %1379 = vmatmul.mubr.msk.bf16.vlgmr.msra.gmra.mrb[4].mxu0 %vm658_vm11, %v1463_v55 }
 0x503   : > { %800 = sbr.rel (!%p345_p5) target bundleno = 1290 (0x50a), region = 76 }
 0x506   : > { %v1380_v56 = vpop.f32.mrb[4].mxu0 }
 0x507   : > { %v784_v57 = vpop.f32.mrb[5].mxu0 }
 0x508   : > { %v1381_v58 = vpop.f32.mrb[6].mxu0 }
 0x509   : > { %v787_v59 = vpop.f32.mrb[7].mxu0 }
 0x50a PF: > { %818 = vadd.xlane.f32.xlu1 %v1380_v56  ;;  %814 = vadd.xlane.f32.xlu0 %v784_v57  ;;  %v836_v61 = vmul.f32 %v787_v59, %v787_v59  ;;  %v835_v62 = vmul.f32 %v784_v57, %v784_v57  ;;  %v838_v63 = vmul.f32 %v1381_v58, %v1381_v58  ;;  %v812_v2 = vld [vmem:[#allocation4 + $0x10] sm:$0xff]  ;;  %v810_v3 = vld [vmem:[#allocation4] sm:$0xff]  ;;  %vm826_vm13 = vcmask 7168   ;;  %v813_v8 = vld [vmem:[#allocation4 + $0x18] sm:$0xff] }
 0x50b   : > { %v837_v1 = vmul.f32 %v1380_v56, %v1380_v56  ;;  %v811_v9 = vld [vmem:[#allocation4 + $0x8] sm:$0xff]  ;;  %v831_v15 = vld [vmem:[#allocation5] sm:$0xff]  ;;  %v834_v20 = vld [vmem:[#allocation5 + $0x18] sm:$0xff] }
 0x50c   : > { %v832_v14 = vld [vmem:[#allocation5 + $0x8] sm:$0xff]  ;;  %v833_v21 = vld [vmem:[#allocation5 + $0x10] sm:$0xff] }
 0x50e   : > { %820 = vadd.xlane.f32.xlu1 %v1381_v58  ;;  %816 = vadd.xlane.f32.xlu0 %v787_v59 }
 0x512   : > { %841 = vadd.xlane.f32.xlu1 %v836_v61  ;;  %839 = vadd.xlane.f32.xlu0 %v835_v62 }
 0x516   : > { %845 = vadd.xlane.f32.xlu1 %v838_v63  ;;  %843 = vadd.xlane.f32.xlu0 %v837_v1 }
 0x597   : > { %v819_v4 = vpop.xlane.xlu1 %818  ;;  %v815_v5 = vpop.xlane.xlu0 %814 }
 0x598   : > { %v824_v6 = vadd.f32 %v819_v4, %v812_v2  ;;  %v822_v7 = vadd.f32 %v815_v5, %v810_v3 }
 0x59a   : > { %829 = vst.msk [vmem:[#allocation4 + $0x10] sm:$0xff] %vm826_vm13, %v824_v6  ;;  %827 = vst.msk [vmem:[#allocation4] sm:$0xff] %vm826_vm13, %v822_v7 }
 0x59b   : > { %v821_v10 = vpop.xlane.xlu1 %820  ;;  %v817_v11 = vpop.xlane.xlu0 %816 }
 0x59c   : > { %v825_v12 = vadd.f32 %v821_v10, %v813_v8  ;;  %v823_v13 = vadd.f32 %v817_v11, %v811_v9 }
 0x59e   : > { %830 = vst.msk [vmem:[#allocation4 + $0x18] sm:$0xff] %vm826_vm13, %v825_v12  ;;  %828 = vst.msk [vmem:[#allocation4 + $0x8] sm:$0xff] %vm826_vm13, %v823_v13 }
 0x59f   : > { %v842_v16 = vpop.xlane.xlu1 %841  ;;  %v840_v17 = vpop.xlane.xlu0 %839 }
 0x5a0   : > { %v848_v18 = vadd.f32 %v842_v16, %v832_v14  ;;  %v847_v19 = vadd.f32 %v840_v17, %v831_v15 }
 0x5a2   : > { %852 = vst.msk [vmem:[#allocation5 + $0x8] sm:$0xff] %vm826_vm13, %v848_v18  ;;  %851 = vst.msk [vmem:[#allocation5] sm:$0xff] %vm826_vm13, %v847_v19 }
 0x5a3   : > { %v846_v22 = vpop.xlane.xlu1 %845  ;;  %v844_v23 = vpop.xlane.xlu0 %843 }
 0x5a4   : > { %v850_v24 = vadd.f32 %v846_v22, %v834_v20  ;;  %v849_v25 = vadd.f32 %v844_v23, %v833_v21 }
 0x5a6   : > { %854 = vst.msk [vmem:[#allocation5 + $0x18] sm:$0xff] %vm826_vm13, %v850_v24  ;;  %853 = vst.msk [vmem:[#allocation5 + $0x10] sm:$0xff] %vm826_vm13, %v849_v25 }
 0x5a7 PF: > { %p1322_p8 = scmp.ne.s32.totalorder %s1512_s14, 2 }
 0x5a8   : > { %vm954_vm14 = vcmask (!%p1322_p8), 1042432   ;;  %vm955_vm15 = vcmask (!%p1322_p8), 1043456   ;;  %v1536_v26 = vmov (!%p1322_p8), 0.0   ;;  %v1537_v27 = vmov (!%p1322_p8), 65535   ;;  %v1002_v30 = vld [vmem:[%s1870_s2] sm:$0xff] (!%p1322_p8)  ;;  %v863_v35 = vld [vmem:[#allocation3] sm:$0xff] (!%p1322_p8) }
 0x5a9   : > { %858 = sbr.rel (%p1322_p8) target bundleno = 2280 (0x8e8), region = 80  ;;  %1382 = vmatprep.subr.bf16.mxu0 (!%p1322_p8), %v1536_v26  ;;  %v956_v28 = vsel (!%p1322_p8), %vm954_vm14, 4294967295, %v1537_v27  ;;  %1388 = vmatprep.subr.bf16.mxu1 (!%p1322_p8), %v1536_v26  ;;  %vm1538_vm0 = vmmov (!%p1322_p8), 0   ;;  %v1004_v31 = vld [vmem:[%s1871_s3] sm:$0xff] (!%p1322_p8)  ;;  %v1539_v33 = vmov (!%p1322_p8), 0   ;;  %v865_v38 = vmul.f32 (!%p1322_p8), 0.00390625, %v863_v35 }
 0x5aa   : > { %v957_v29 = vsel (!%p1322_p8), %vm955_vm15, %v956_v28, 0  ;;  %1384 = vmatprep.mubr.msk.bf16.mxu0 (!%p1322_p8), %vm1538_vm0, %v1536_v26  ;;  %1390 = vmatprep.mubr.msk.bf16.mxu1 (!%p1322_p8), %vm1538_vm0, %v1536_v26  ;;  %v859_v34 = vld [vmem:[#allocation2] sm:$0xff] (!%p1322_p8)  ;;  %v860_v39 = vld [vmem:[#allocation2 + $0x8] sm:$0xff] (!%p1322_p8)  ;;  %v864_v40 = vld [vmem:[#allocation3 + $0x8] sm:$0xff] (!%p1322_p8)  ;;  %vm950_vm1 = vcmask (!%p1322_p8), 56320   ;;  %vm1040_vm2 = vcmask (!%p1322_p8), 130048  }
 0x5ab   : > { %v959_v32 = vand.u32 (!%p1322_p8), %v957_v29, %v1634_v0  ;;  %1468 = vset.pattern.permute.xlu0 (!%p1322_p8), %v1539_v33  ;;  %1469 = vset.pattern.permute.xlu1 (!%p1322_p8), %v1539_v33  ;;  %v1470_v36 = vld [vmem:[%s1869_s1] sm:$0xff] (!%p1322_p8)   ;;  %v1720_v37 = vmul.f32 (!%p1322_p8), 0.00390625, %v859_v34  ;;  %v1003_v0 = vld [vmem:[%s1870_s2 + $0x8] sm:$0xff] (!%p1322_p8)  ;;  %v1725_v41 = vmul.f32 (!%p1322_p8), 0.00390625, %v860_v39  ;;  %v866_v42 = vmul.f32 (!%p1322_p8), 0.00390625, %v864_v40  ;;  %v889_v55 = vld [vmem:[#allocation4 + $0x10] sm:$0xff] (!%p1322_p8) }
 0x5ac   : > { %1008 = vperm.xlu0 (!%p1322_p8), %1468, %v1002_v30   ;;  %1020 = vperm.xlu1 (!%p1322_p8), %1469, %v1004_v31   ;;  %v1005_v43 = vld [vmem:[%s1871_s3 + $0x8] sm:$0xff] (!%p1322_p8)  ;;  %v887_v45 = vld [vmem:[#allocation4] sm:$0xff] (!%p1322_p8)  ;;  %v1740_v59 = vmul.f32 (!%p1322_p8), 0.00390625, %v889_v55  ;;  %v890_v61 = vld [vmem:[#allocation4 + $0x18] sm:$0xff] (!%p1322_p8)  ;;  %vm1265_vm4 = vcmask (!%p1322_p8), 15360  }
 0x5ad   : > { %1383 = vmatpush3.bf16.msra.mxu0 (!%p1322_p8), %v959_v32  ;;  %v867_v44 = vmul.f32 (!%p1322_p8), %v1720_v37, %v1720_v37  ;;  %v895_v46 = vld [vmem:[#allocation5] sm:$0xff] (!%p1322_p8)  ;;  %v868_v47 = vmul.f32 (!%p1322_p8), %v1725_v41, %v1725_v41  ;;  %v1734_v48 = vmul.f32 (!%p1322_p8), 0.00390625, %v887_v45  ;;  %v888_v50 = vld [vmem:[#allocation4 + $0x8] sm:$0xff] (!%p1322_p8)  ;;  %v897_v56 = vld [vmem:[#allocation5 + $0x10] sm:$0xff] (!%p1322_p8)  ;;  %v1744_v2 = vmul.f32 (!%p1322_p8), 0.00390625, %v890_v61 }
 0x5ae   : > { %v899_v49 = vmul.f32 (!%p1322_p8), 0.00390625, %v895_v46  ;;  %v896_v51 = vld [vmem:[#allocation5 + $0x8] sm:$0xff] (!%p1322_p8)  ;;  %v1736_v53 = vmul.f32 (!%p1322_p8), 0.00390625, %v888_v50  ;;  %v901_v60 = vmul.f32 (!%p1322_p8), 0.00390625, %v897_v56  ;;  %v898_v62 = vld [vmem:[#allocation5 + $0x18] sm:$0xff] (!%p1322_p8)  ;;  %v905_v6 = vmul.f32 (!%p1322_p8), %v1740_v59, %v1740_v59  ;;  %v873_v21 = vld [vmem:[%s1873_s5] sm:$0xff] (!%p1322_p8) }
 0x5af   : > { %v869_v52 = vsub.f32 (!%p1322_p8), %v865_v38, %v867_v44  ;;  %v900_v54 = vmul.f32 (!%p1322_p8), 0.00390625, %v896_v51  ;;  %v870_v57 = vsub.f32 (!%p1322_p8), %v866_v42, %v868_v47  ;;  %v903_v58 = vmul.f32 (!%p1322_p8), %v1734_v48, %v1734_v48  ;;  %v874_v22 = vld [vmem:[%s1873_s5 + $0x8] sm:$0xff] (!%p1322_p8)  ;;  %v881_v27 = vld [vmem:[%s1874_s6] sm:$0xff] (!%p1322_p8)  ;;  %v917_v40 = vld [vmem:[%s1876_s8 + $0x10] sm:$0xff] (!%p1322_p8) }
 0x5b0   : > { %1385 = vmatmul.mubr.msk.bf16.vlgmr.msra.gmra.mrb[0].mxu0 %vm950_vm1, %v1470_v36  ;;  %1013 = vperm.xlu0 %1468, %v1003_v0   ;;  %v904_v1 = vmul.f32 %v1736_v53, %v1736_v53  ;;  %v902_v3 = vmul.f32 0.00390625, %v898_v62  ;;  %v906_v9 = vmul.f32 %v1744_v2, %v1744_v2  ;;  %v909_v12 = vsub.f32 %v901_v60, %v905_v6  ;;  %v882_v29 = vld [vmem:[%s1874_s6 + $0x8] sm:$0xff]  ;;  %v915_v32 = vld [vmem:[%s1876_s8] sm:$0xff] }
 0x5b1   : > { %1025 = vperm.xlu1 %1469, %v1005_v43   ;;  %v871_v63 = vmax.f32 %v869_v52, 0.0  ;;  %v872_v4 = vmax.f32 %v870_v57, 0.0  ;;  %v907_v5 = vsub.f32 %v899_v49, %v903_v58  ;;  %v916_v35 = vld [vmem:[%s1876_s8 + $0x8] sm:$0xff]  ;;  %v931_v45 = vld [vmem:[%s1877_s9] sm:$0xff] }
 0x5b2   : > { %v908_v8 = vsub.f32 %v900_v54, %v904_v1  ;;  %v910_v14 = vsub.f32 %v902_v3, %v906_v9  ;;  %v913_v16 = vmax.f32 %v909_v12, 0.0  ;;  %v932_v47 = vld [vmem:[%s1877_s9 + $0x8] sm:$0xff]  ;;  %v1472_v9 = vld [vmem:[%s1875_s7] sm:$0xff]  }
 0x5b3   : > { %v875_v7 = vadd.f32 1e-05, %v871_v63  ;;  %v876_v10 = vadd.f32 1e-05, %v872_v4  ;;  %v911_v11 = vmax.f32 %v907_v5, 0.0  ;;  %1396 = vmatprep.mubr.msk.bf16.mxu0 %vm1040_vm2, %v1472_v9 }
 0x5b4   : > { %v912_v13 = vmax.f32 %v908_v8, 0.0  ;;  %v914_v18 = vmax.f32 %v910_v14, 0.0  ;;  %v921_v19 = vadd.f32 1e-05, %v913_v16  ;;  %v1471_v8 = vld [vmem:[%s1872_s4] sm:$0xff]  }
 0x5b5   : > { %1474 = vrsqrt.f32 %v875_v7  ;;  %v919_v15 = vadd.f32 1e-05, %v911_v11 }
 0x5b6   : > { %1476 = vrsqrt.f32 %v876_v10  ;;  %v920_v17 = vadd.f32 1e-05, %v912_v13  ;;  %v922_v20 = vadd.f32 1e-05, %v914_v18 }
 0x5b7   : > { %1478 = vrsqrt.f32 %v919_v15 }
 0x5b8   : > { %1480 = vrsqrt.f32 %v920_v17 }
 0x5b9   : > { %1482 = vrsqrt.f32 %v921_v19 }
 0x5ba   : > { %1484 = vrsqrt.f32 %v922_v20 }
 0x5bf   : > { %v1475_v23 = vpop.eup %1474 }
 0x5c0   : > { %v1477_v24 = vpop.eup %1476  ;;  %v879_v25 = vmul.f32 %v1475_v23, %v873_v21 }
 0x5c1   : > { %v880_v26 = vmul.f32 %v1477_v24, %v874_v22  ;;  %v1479_v30 = vpop.eup %1478 }
 0x5c2   : > { %1087 = vperm.xlu0 %1468, %v879_v25   ;;  %v883_v28 = vmul.f32 %v879_v25, %v1720_v37  ;;  %v1481_v33 = vpop.eup %1480  ;;  %v927_v37 = vmul.f32 %v1479_v30, %v915_v32  ;;  %v1473_v25 = vld [vmem:[%s1875_s7 + $0x8] sm:$0xff]  }
 0x5c3   : > { %1092 = vperm.xlu1 %1469, %v880_v26   ;;  %v884_v31 = vmul.f32 %v880_v26, %v1725_v41  ;;  %v1483_v38 = vpop.eup %1482  ;;  %v928_v39 = vmul.f32 %v1481_v33, %v916_v35  ;;  %v918_v41 = vld [vmem:[%s1876_s8 + $0x18] sm:$0xff] }
 0x5c4   : > { %v885_v34 = vsub.f32 %v881_v27, %v883_v28  ;;  %v1485_v0 = vpop.eup %1484  ;;  %v929_v42 = vmul.f32 %v1483_v38, %v917_v40  ;;  %v935_v43 = vmul.f32 %v927_v37, %v1734_v48  ;;  %v933_v48 = vld [vmem:[%s1877_s9 + $0x10] sm:$0xff] }
 0x5c5   : > { %v886_v36 = vsub.f32 %v882_v29, %v884_v31  ;;  %v930_v44 = vmul.f32 %v1485_v0, %v918_v41  ;;  %v936_v46 = vmul.f32 %v928_v39, %v1736_v53  ;;  %v934_v53 = vld [vmem:[%s1877_s9 + $0x18] sm:$0xff] }
 0x5c6   : > { %1099 = vperm.xlu0 %1468, %v885_v34   ;;  %v939_v49 = vsub.f32 %v931_v45, %v935_v43  ;;  %v937_v50 = vmul.f32 %v929_v42, %v1740_v59 }
 0x5c7   : > { %1104 = vperm.xlu1 %1469, %v886_v36   ;;  %v940_v51 = vsub.f32 %v932_v47, %v936_v46  ;;  %v938_v52 = vmul.f32 %v930_v44, %v1744_v2 }
 0x5c8   : > { %v941_v54 = vsub.f32 %v933_v48, %v937_v50  ;;  %v1241_v50 = vlaneseq  ;;  %v1247_v48 = vstv %s1508_s13 }
 0x5c9   : > { %v942_v55 = vsub.f32 %v934_v53, %v938_v52  ;;  %v1243_v52 = vld [vmem:[%s1878_s10] sm:$0xff] }
 0x5ca   : > { %1183 = vperm.xlu0 %1468, %v927_v37  }
 0x5cb   : > { %1188 = vperm.xlu1 %1469, %v928_v39  }
 0x5ce   : > { %1193 = vperm.xlu0 %1468, %v929_v42  }
 0x5cf   : > { %1198 = vperm.xlu1 %1469, %v930_v44  }
 0x5d2   : > { %1207 = vperm.xlu0 %1468, %v939_v49  }
 0x5d3   : > { %1212 = vperm.xlu1 %1469, %v940_v51   ;;  %v1242_v51 = vand.u32 127, %v1241_v50 }
 0x5d5   : > { %vm1808_vm3 = vcmp.eq.s32.totalorder %v1242_v51, %v1247_v48 }
 0x5d6   : > { %1217 = vperm.xlu0 %1468, %v941_v54   ;;  %v1244_v54 = vld [vmem:[%s1878_s10 + $0x8] sm:$0xff] }
 0x5d7   : > { %1222 = vperm.xlu1 %1469, %v942_v55   ;;  %v1253_v55 = vsel %vm1808_vm3, -inf, %v1243_v52 }
 0x62b   : > { %v1009_v56 = vpop.permute.xlu0 %1008  ;;  %v1021_v57 = vpop.permute.xlu1 %1020 }
 0x62f   : > { %v1014_v61 = vpop.permute.xlu0 %1013 }
 0x630   : > { %v1026_v3 = vpop.permute.xlu1 %1025 }
 0x641   : > { %v1088_v10 = vpop.permute.xlu0 %1087 }
 0x642   : > { %v1093_v11 = vpop.permute.xlu1 %1092 }
 0x645   : > { %v1100_v15 = vpop.permute.xlu0 %1099 }
 0x646   : > { %v1105_v20 = vpop.permute.xlu1 %1104 }
 0x649   : > { %v1184_v26 = vpop.permute.xlu0 %1183 }
 0x64a   : > { %v1189_v27 = vpop.permute.xlu1 %1188 }
 0x64d   : > { %v1194_v28 = vpop.permute.xlu0 %1193 }
 0x64e   : > { %v1199_v29 = vpop.permute.xlu1 %1198 }
 0x651   : > { %v1208_v30 = vpop.permute.xlu0 %1207 }
 0x652   : > { %v1213_v36 = vpop.permute.xlu1 %1212 }
 0x655   : > { %v1218_v40 = vpop.permute.xlu0 %1217 }
 0x656   : > { %v1223_v45 = vpop.permute.xlu1 %1222 }
 0x683   : > { %v995_v58 = vpop.f32.mrb[0].mxu0 }
 0x684   : > { %v1016_v59 = vmul.f32 %v1009_v56, %v995_v58  ;;  %v1386_v60 = vpop.f32.mrb[1].mxu0  ;;  %v1245_v56 = vld [vmem:[%s1878_s10 + $0x10] sm:$0xff]  ;;  %v1254_v58 = vsel %vm1808_vm3, -inf, %v1244_v54 }
 0x685   : > { %v998_v62 = vpop.f32.mrb[2].mxu0 }
 0x686   : > { %v1028_v63 = vadd.f32 %v1021_v57, %v1016_v59  ;;  %v1017_v1 = vmul.f32 %v1014_v61, %v998_v62  ;;  %v1387_v2 = vpop.f32.mrb[3].mxu0  ;;  %v1255_v61 = vsel %vm1808_vm3, -inf, %v1245_v56 }
 0x688   : > { %v1029_v4 = vadd.f32 %v1026_v3, %v1017_v1  ;;  %v1030_v5 = vmax.f32 %v1028_v63, 0.0  ;;  %v1246_v1 = vld [vmem:[%s1878_s10 + $0x18] sm:$0xff] }
 0x68a   : > { %v1031_v6 = vmax.f32 %v1029_v4, 0.0 }
 0x68c   : > { %v1034_v7 = vpack.c.bf16 %v1031_v6, %v1030_v5  ;;  %v1256_v5 = vsel %vm1808_vm3, -inf, %v1246_v1 }
 0x68e   : > { %1389 = vmatpush3.bf16.msra.mxu1 %v1034_v7 }
 0x691   : > { %1391 = vmatmul.mubr.msk.bf16.vlgmr.msra.gmra.mrb[0].mxu1 %vm1040_vm2, %v1471_v8 }
 0x764   : > { %v1078_v12 = vpop.f32.mrb[0].mxu1 }
 0x765   : > { %v1095_v13 = vmul.f32 %v1088_v10, %v1078_v12  ;;  %v1392_v14 = vpop.f32.mrb[1].mxu1 }
 0x766   : > { %v1081_v16 = vpop.f32.mrb[2].mxu1 }
 0x767   : > { %v1107_v17 = vadd.f32 %v1100_v15, %v1095_v13  ;;  %v1096_v18 = vmul.f32 %v1093_v11, %v1081_v16  ;;  %v1393_v19 = vpop.f32.mrb[3].mxu1 }
 0x769   : > { %v1108_v21 = vadd.f32 %v1105_v20, %v1096_v18  ;;  %v1109_v22 = vmax.f32 %v1107_v17, 0.0 }
 0x76b   : > { %v1110_v23 = vmax.f32 %v1108_v21, 0.0 }
 0x76d   : > { %v1115_v24 = vpack.c.bf16 %v1110_v23, %v1109_v22 }
 0x76f   : > { %1394 = vmatprep.subr.bf16.mxu0 %v1115_v24 }
 0x770   : > { %1395 = vmatpush3.bf16.msra.mxu0 %v1115_v24 }
 0x773   : > { %1397 = vmatmul.mubr.msk.bf16.vlgmr.msra.gmra.mrb[4].mxu0 %vm1040_vm2, %v1473_v25 }
 0x846   : > { %v1398_v31 = vpop.f32.mrb[4].mxu0 }
 0x847   : > { %v1166_v32 = vpop.f32.mrb[5].mxu0  ;;  %v1203_v33 = vmul.f32 %v1398_v31, %v1194_v28 }
 0x848   : > { %v1201_v34 = vmul.f32 %v1184_v26, %v1166_v32  ;;  %v1399_v35 = vpop.f32.mrb[6].mxu0 }
 0x849   : > { %v1169_v37 = vpop.f32.mrb[7].mxu0  ;;  %v1204_v0 = vmul.f32 %v1399_v35, %v1199_v29  ;;  %v1227_v43 = vadd.f32 %v1218_v40, %v1203_v33 }
 0x84a   : > { %v1202_v38 = vmul.f32 %v1189_v27, %v1169_v37  ;;  %v1225_v39 = vadd.f32 %v1208_v30, %v1201_v34 }
 0x84b   : > { %v1231_v46 = vmax.f32 %v1227_v43, 0.0  ;;  %v1228_v47 = vadd.f32 %v1223_v45, %v1204_v0 }
 0x84c   : > { %v1229_v41 = vmax.f32 %v1225_v39, 0.0  ;;  %v1226_v42 = vadd.f32 %v1213_v36, %v1202_v38 }
 0x84d   : > { %v1232_v49 = vmax.f32 %v1228_v47, 0.0 }
 0x84e   : > { %1233 = vmax.xlane.f32.xlu0 %v1229_v41  ;;  %v1230_v44 = vmax.f32 %v1226_v42, 0.0 }
 0x850   : > { %1235 = vmax.xlane.f32.xlu1 %v1230_v44 }
 0x852   : > { %1237 = vmax.xlane.f32.xlu0 %v1231_v46 }
 0x856   : > { %1239 = vmax.xlane.f32.xlu0 %v1232_v49 }
 0x8db   : > { %v1234_v57 = vpop.xlane.xlu0 %1233 }
 0x8dc   : > { %v1257_v59 = vmax.f32 %v1253_v55, %v1234_v57 }
 0x8dd   : > { %v1236_v60 = vpop.xlane.xlu1 %1235 }
 0x8de   : > { %v1261_v62 = vsel %vm1808_vm3, %v1257_v59, %v1253_v55  ;;  %v1258_v63 = vmax.f32 %v1254_v58, %v1236_v60 }
 0x8df   : > { %1266 = vst.msk [vmem:[%s1878_s10] sm:$0xff] %vm1265_vm4, %v1261_v62  ;;  %v1238_v2 = vpop.xlane.xlu0 %1237 }
 0x8e0   : > { %v1262_v3 = vsel %vm1808_vm3, %v1258_v63, %v1254_v58  ;;  %v1259_v4 = vmax.f32 %v1255_v61, %v1238_v2 }
 0x8e1   : > { %1267 = vst.msk [vmem:[%s1878_s10 + $0x8] sm:$0xff] %vm1265_vm4, %v1262_v3 }
 0x8e2   : > { %v1263_v6 = vsel %vm1808_vm3, %v1259_v4, %v1255_v61 }
 0x8e3   : > { %1268 = vst.msk [vmem:[%s1878_s10 + $0x10] sm:$0xff] %vm1265_vm4, %v1263_v6  ;;  %v1240_v7 = vpop.xlane.xlu0 %1239 }
 0x8e4   : > { %v1260_v8 = vmax.f32 %v1256_v5, %v1240_v7 }
 0x8e6   : > { %v1264_v9 = vsel %vm1808_vm3, %v1260_v8, %v1256_v5 }
 0x8e7   : > { %1269 = vst.msk [vmem:[%s1878_s10 + $0x18] sm:$0xff] %vm1265_vm4, %v1264_v9 }
 0x8e8 PF: > { %s20_s17 = sadd.s32 1, %s1524_s17   ;;  %s1881_s13 = smov %s1516_s15 }
 0x8e9   : > { %p17_p9 = scmp.ge.s32.totalorder %s20_s17, 8   ;;  %s1882_s14 = smov %s1520_s16 }
 0x8ea   : > { %s1883_s15 = smov %s1886_s18  ;;  %s1884_s16 = smov %s1890_s19 }
 0x8eb   :  { %19 = sbr.rel (!%p17_p9) target bundleno = 3 (0x3), region = 104 }

// kernel: pointnet_sa_msg_forward.3
= control target key start
LH: loop header
LB: loop body
LE: loop exit
PB: predicated region body
PF: predicated region fallthrough
CT: control target
= control target key end

     0   :  { %s1639_s13 = smov 0   ;;  %s1641_s14 = smov 0   ;;  %s1934_s0 = inlined_call_operand.vmem [shape: bf16[2,7,256], index: 0, kind: input, shape index: {}]   ;;  %s1935_s1 = inlined_call_operand.vmem [shape: bf16[16,7], index: 1, kind: input, shape index: {}]   ;;  %s1936_s2 = inlined_call_operand.vmem [shape: f32[16,1], index: 2, kind: input, shape index: {}]   ;;  %s1937_s3 = inlined_call_operand.vmem [shape: f32[16,1], index: 3, kind: input, shape index: {}]   ;;  %s1938_s4 = inlined_call_operand.vmem [shape: bf16[16,16], index: 4, kind: input, shape index: {}]   ;;  %s1939_s5 = inlined_call_operand.vmem [shape: f32[16,1], index: 5, kind: input, shape index: {}]   ;;  %s1940_s6 = inlined_call_operand.vmem [shape: f32[16,1], index: 6, kind: input, shape index: {}]   ;;  %s1941_s7 = inlined_call_operand.vmem [shape: bf16[32,16], index: 7, kind: input, shape index: {}]   ;;  %s1942_s8 = inlined_call_operand.vmem [shape: f32[32,1], index: 8, kind: input, shape index: {}]   ;;  %s1943_s9 = inlined_call_operand.vmem [shape: f32[32,1], index: 9, kind: input, shape index: {}]   ;;  %s1944_s10 = inlined_call_operand.vmem [shape: f32[32,2], index: 10, kind: output, shape index: {}]  }
   0x1   :  { %s1643_s15 = smov 0   ;;  %s1645_s16 = smov 0  }
   0x2   :  { %s1647_s17 = smov 0  }
   0x3 LB: > { %s35_s18 = sadd.s32 1, %s1566_s15  ;;  %s39_s19 = sadd.s32 1, %s1570_s16  ;;  %s1574_s17 = sphi %s1647_s17, %s20_s17   ;;  %s1570_s16 = sphi %s1645_s16, %s1950_s16   ;;  %s1566_s15 = sphi %s1643_s15, %s1949_s15   ;;  %s1562_s14 = sphi %s1641_s14, %s1948_s14   ;;  %s1558_s13 = sphi %s1639_s13, %s1947_s13  }
   0x4   : > { %p37_p0 = scmp.ge.s32.totalorder %s35_s18, 2  ;;  %p1419_p1 = scmp.ge.s32.totalorder %s1574_s17, 1 }
   0x5   : > { %p316_p2 = scmp.lt.s32.totalorder %s1574_s17, 7 }
   0x6   : > { %s1952_s18 = smov (%p37_p0, %s35_s18), 0  ;;  %s1954_s19 = smov (!%p37_p0, %s39_s19), %s1570_s16 }
   0x7   : > { %p317_p3 = pnand %p1419_p1, %p316_p2  ;;  %p41_p4 = scmp.ge.s32.totalorder %s1954_s19, 3 }
   0x8   : > { %p345_p5 = scmp.eq.s32.totalorder (!%p317_p3), %s1558_s13, 0  ;;  %s1455_s20 = sshll.u32 (!%p317_p3), %s1558_s13, 3 }
   0x9   : > { %s1956_s19 = smov (%p41_p4, %s1954_s19), 0  ;;  %320 = sbr.rel (%p317_p3) target bundleno = 2309 (0x905), region = 60 }
   0xa   : > { %s352_s23 = scalar_lea.vmem (!%p317_p3), %s1934_s0, %s1455_s20  ;;  %p1423_p6 = scmp.ne.s32.totalorder (!%p317_p3), %s1562_s14, 0 }
   0xb   : > { %v1678_v0 = vld [vmem:[%s352_s23] sm:$0xff] (!%p317_p3) }
  0x10   : > { %357 = sbr.rel (%p1423_p6) target bundleno = 620 (0x26c), region = 64  ;;  %v1426_v1 = vcombine.high (!%p1423_p6), %v1678_v0, %v1678_v0  ;;  %vm374_vm0 = vcmask (!%p1423_p6), 1042432   ;;  %vm375_vm1 = vcmask (!%p1423_p6), 1043456   ;;  %v1576_v2 = vmov (!%p1423_p6), 65535   ;;  %v427_v5 = vld [vmem:[%s1936_s2] sm:$0xff] (!%p1423_p6)  ;;  %v428_v11 = vld [vmem:[%s1936_s2 + $0x8] sm:$0xff] (!%p1423_p6) }
  0x11   : > { %v376_v3 = vsel (!%p1423_p6), %vm374_vm0, 4294967295, %v1576_v2  ;;  %v1425_v4 = vcombine.low (!%p1423_p6), %v1678_v0, %v1678_v0  ;;  %v1577_v7 = vmov (!%p1423_p6), 0   ;;  %v429_v8 = vld [vmem:[%s1937_s3] sm:$0xff] (!%p1423_p6)  ;;  %v430_v13 = vld [vmem:[%s1937_s3 + $0x8] sm:$0xff] (!%p1423_p6)  ;;  %vm370_vm2 = vcmask (!%p1423_p6), 56320  }
  0x12   : > { %v377_v6 = vsel (!%p1423_p6), %vm375_vm1, %v376_v3, 0  ;;  %416 = vmatprep.mubr.bf16.mxu0 (!%p1423_p6), %v1577_v7  ;;  %1504 = vset.pattern.permute.xlu0 (!%p1423_p6), %v1577_v7  ;;  %v1506_v12 = vld [vmem:[%s1935_s1] sm:$0xff] (!%p1423_p6)   ;;  %vm472_vm3 = vcmask (!%p1423_p6), 130048  }
  0x13   : > { %v382_v9 = vand.u32 (!%p1423_p6), %v1426_v1, %v377_v6  ;;  %v379_v10 = vand.u32 (!%p1423_p6), %v1425_v4, %v377_v6  ;;  %433 = vperm.xlu0 (!%p1423_p6), %1504, %v427_v5   ;;  %1505 = vset.pattern.permute.xlu1 (!%p1423_p6), %v1577_v7  ;;  %v1507_v36 = vld [vmem:[%s1938_s4] sm:$0xff] (!%p1423_p6)  }
  0x14   : > { %447 = vperm.xlu1 (!%p1423_p6), %1505, %v429_v8   ;;  %508 = vmatprep.mubr.bf16.mxu1 (!%p1423_p6), %v1577_v7 }
  0x15   : > { %384 = vmatprep.subr.bf16.mxu0 (!%p1423_p6), %v382_v9 }
  0x16   : > { %385 = vmatpush1.bf16.msra.mxu0 (!%p1423_p6), %v379_v10 }
  0x17   : > { %438 = vperm.xlu0 %1504, %v428_v11   ;;  %vm521_vm4 = vcmask (%p345_p5), 7168   ;;  %v1578_v41 = vmov (%p345_p5), 0.0  }
  0x18   : > { %452 = vperm.xlu1 %1505, %v430_v13   ;;  %522 = vst.msk [vmem:[#allocation2] sm:$0xff] (%p345_p5), %vm521_vm4, %v1578_v41  ;;  %523 = vst.msk [vmem:[#allocation2 + $0x8] sm:$0xff] (%p345_p5), %vm521_vm4, %v1578_v41 }
  0x19   : > { %1427 = vmatmul.mubr.msk.bf16.vlgmr.msra.gmra.mrb[0].mxu0 %vm370_vm2, %v1506_v12  ;;  %524 = vst.msk [vmem:[#allocation3] sm:$0xff] (%p345_p5), %vm521_vm4, %v1578_v41  ;;  %525 = vst.msk [vmem:[#allocation3 + $0x8] sm:$0xff] (%p345_p5), %vm521_vm4, %v1578_v41 }
  0x92   : > { %v434_v14 = vpop.permute.xlu0 %433 }
  0x93   : > { %v448_v15 = vpop.permute.xlu1 %447 }
  0x96   : > { %v439_v19 = vpop.permute.xlu0 %438 }
  0x97   : > { %v453_v25 = vpop.permute.xlu1 %452 }
  0xec   : > { %v418_v16 = vpop.f32.mrb[0].mxu0 }
  0xed   : > { %v441_v17 = vmul.f32 %v434_v14, %v418_v16  ;;  %v420_v18 = vpop.f32.mrb[1].mxu0 }
  0xee   : > { %v442_v20 = vmul.f32 %v434_v14, %v420_v18  ;;  %v422_v21 = vpop.f32.mrb[2].mxu0 }
  0xef   : > { %v455_v22 = vadd.f32 %v448_v15, %v441_v17  ;;  %v443_v23 = vmul.f32 %v439_v19, %v422_v21  ;;  %v424_v24 = vpop.f32.mrb[3].mxu0 }
  0xf0   : > { %v444_v26 = vmul.f32 %v439_v19, %v424_v24  ;;  %v456_v27 = vadd.f32 %v448_v15, %v442_v20 }
  0xf1   : > { %v457_v28 = vadd.f32 %v453_v25, %v443_v23  ;;  %v459_v30 = vmax.f32 %v455_v22, 0.0 }
  0xf2   : > { %v458_v29 = vadd.f32 %v453_v25, %v444_v26  ;;  %v460_v32 = vmax.f32 %v456_v27, 0.0 }
  0xf3   : > { %v461_v31 = vmax.f32 %v457_v28, 0.0 }
  0xf4   : > { %v462_v33 = vmax.f32 %v458_v29, 0.0 }
  0xf5   : > { %v465_v34 = vpack.c.bf16 %v461_v31, %v459_v30 }
  0xf6   : > { %v466_v35 = vpack.c.bf16 %v462_v33, %v460_v32 }
  0xf8   : > { %476 = vmatprep.subr.bf16.mxu1 %v466_v35 }
  0xf9   : > { %477 = vmatpush1.bf16.msra.mxu1 %v465_v34 }
  0xfc   : > { %1429 = vmatmul.mubr.msk.bf16.vlgmr.msra.gmra.mrb[0].mxu1 %vm472_vm3, %v1507_v36 }
 0x1cc   : > { %520 = sbr.rel (!%p345_p5) target bundleno = 467 (0x1d3), region = 68 }
 0x1cf   : > { %v510_v37 = vpop.f32.mrb[0].mxu1 }
 0x1d0   : > { %v512_v38 = vpop.f32.mrb[1].mxu1 }
 0x1d1   : > { %v514_v39 = vpop.f32.mrb[2].mxu1 }
 0x1d2   : > { %v516_v40 = vpop.f32.mrb[3].mxu1 }
 0x1d3 PF: > { %v541_v42 = vmul.f32 %v510_v37, %v510_v37  ;;  %v542_v43 = vmul.f32 %v512_v38, %v512_v38  ;;  %v528_v44 = vadd.f32 %v512_v38, %v510_v37  ;;  %v543_v45 = vmul.f32 %v514_v39, %v514_v39  ;;  %v526_v50 = vld [vmem:[#allocation2] sm:$0xff]  ;;  %v539_v51 = vld [vmem:[#allocation3] sm:$0xff]  ;;  %v527_v55 = vld [vmem:[#allocation2 + $0x8] sm:$0xff] }
 0x1d4   : > { %v544_v46 = vmul.f32 %v516_v40, %v516_v40  ;;  %v531_v48 = vadd.f32 %v516_v40, %v514_v39  ;;  %vm536_vm5 = vcmask 7168   ;;  %v540_v57 = vld [vmem:[#allocation3 + $0x8] sm:$0xff] }
 0x1d5   : > { %v545_v47 = vadd.f32 %v542_v43, %v541_v42  ;;  %529 = vadd.xlane.f32.xlu0 %v528_v44 }
 0x1d6   : > { %v548_v49 = vadd.f32 %v544_v46, %v543_v45 }
 0x1d7   : > { %546 = vadd.xlane.f32.xlu1 %v545_v47 }
 0x1d9   : > { %532 = vadd.xlane.f32.xlu0 %v531_v48 }
 0x1db   : > { %549 = vadd.xlane.f32.xlu1 %v548_v49 }
 0x262   : > { %v530_v52 = vpop.xlane.xlu0 %529 }
 0x263   : > { %v534_v53 = vadd.f32 %v530_v52, %v526_v50 }
 0x264   : > { %v547_v54 = vpop.xlane.xlu1 %546 }
 0x265   : > { %v551_v56 = vadd.f32 %v547_v54, %v539_v51  ;;  %537 = vst.msk [vmem:[#allocation2] sm:$0xff] %vm536_vm5, %v534_v53 }
 0x266   : > { %v533_v58 = vpop.xlane.xlu0 %532 }
 0x267   : > { %553 = vst.msk [vmem:[#allocation3] sm:$0xff] %vm536_vm5, %v551_v56  ;;  %v535_v59 = vadd.f32 %v533_v58, %v527_v55 }
 0x268   : > { %v550_v60 = vpop.xlane.xlu1 %549 }
 0x269   : > { %v552_v61 = vadd.f32 %v550_v60, %v540_v57  ;;  %538 = vst.msk [vmem:[#allocation2 + $0x8] sm:$0xff] %vm536_vm5, %v535_v59 }
 0x26b   : > { %554 = vst.msk [vmem:[#allocation3 + $0x8] sm:$0xff] %vm536_vm5, %v552_v61 }
 0x26c PF: > { %p1430_p7 = scmp.ne.s32.totalorder %s1562_s14, 1 }
 0x26d   : > { %v1433_v62 = vcombine.high (!%p1430_p7), %v1678_v0, %v1678_v0  ;;  %vm603_vm6 = vcmask (!%p1430_p7), 1042432   ;;  %vm604_vm7 = vcmask (!%p1430_p7), 1043456   ;;  %v1579_v63 = vmov (!%p1430_p7), 65535   ;;  %v656_v3 = vld [vmem:[%s1936_s2] sm:$0xff] (!%p1430_p7)  ;;  %v657_v12 = vld [vmem:[%s1936_s2 + $0x8] sm:$0xff] (!%p1430_p7) }
 0x26e   : > { %558 = sbr.rel (%p1430_p7) target bundleno = 1466 (0x5ba), region = 72  ;;  %v605_v1 = vsel (!%p1430_p7), %vm603_vm6, 4294967295, %v1579_v63  ;;  %v1432_v2 = vcombine.low (!%p1430_p7), %v1678_v0, %v1678_v0  ;;  %v1580_v5 = vmov (!%p1430_p7), 0   ;;  %v658_v6 = vld [vmem:[%s1937_s3] sm:$0xff] (!%p1430_p7)  ;;  %v563_v11 = vld [vmem:[#allocation3] sm:$0xff] (!%p1430_p7)  ;;  %vm599_vm8 = vcmask (!%p1430_p7), 56320  }
 0x26f   : > { %v606_v4 = vsel (!%p1430_p7), %vm604_vm7, %v605_v1, 0  ;;  %645 = vmatprep.mubr.bf16.mxu1 (!%p1430_p7), %v1580_v5  ;;  %1508 = vset.pattern.permute.xlu0 (!%p1430_p7), %v1580_v5  ;;  %v1510_v9 = vld [vmem:[%s1935_s1] sm:$0xff] (!%p1430_p7)   ;;  %v565_v14 = vmul.f32 (!%p1430_p7), 0.001953125, %v563_v11  ;;  %v659_v17 = vld [vmem:[%s1937_s3 + $0x8] sm:$0xff] (!%p1430_p7)  ;;  %vm701_vm9 = vcmask (!%p1430_p7), 130048  }
 0x270   : > { %v611_v7 = vand.u32 (!%p1430_p7), %v1433_v62, %v606_v4  ;;  %v608_v8 = vand.u32 (!%p1430_p7), %v1432_v2, %v606_v4  ;;  %662 = vperm.xlu0 (!%p1430_p7), %1508, %v656_v3   ;;  %1509 = vset.pattern.permute.xlu1 (!%p1430_p7), %v1580_v5  ;;  %v559_v10 = vld [vmem:[#allocation2] sm:$0xff] (!%p1430_p7)  ;;  %v560_v15 = vld [vmem:[#allocation2 + $0x8] sm:$0xff] (!%p1430_p7) }
 0x271   : > { %676 = vperm.xlu1 (!%p1430_p7), %1509, %v658_v6   ;;  %v561_v13 = vmul.f32 (!%p1430_p7), 0.001953125, %v559_v10  ;;  %834 = vmatprep.mubr.bf16.mxu0 (!%p1430_p7), %v1580_v5  ;;  %v562_v18 = vmul.f32 (!%p1430_p7), 0.001953125, %v560_v15  ;;  %v573_v28 = vld [vmem:[%s1939_s5] sm:$0xff] (!%p1430_p7)  ;;  %v574_v29 = vld [vmem:[%s1939_s5 + $0x8] sm:$0xff] (!%p1430_p7) }
 0x272   : > { %v564_v16 = vld [vmem:[#allocation3 + $0x8] sm:$0xff] (!%p1430_p7)  ;;  %613 = vmatprep.subr.bf16.mxu1 (!%p1430_p7), %v611_v7  ;;  %v581_v34 = vld [vmem:[%s1940_s6] sm:$0xff] (!%p1430_p7)  ;;  %v582_v36 = vld [vmem:[%s1940_s6 + $0x8] sm:$0xff] (!%p1430_p7) }
 0x273   : > { %v566_v19 = vmul.f32 (!%p1430_p7), 0.001953125, %v564_v16  ;;  %614 = vmatpush1.bf16.msra.mxu1 (!%p1430_p7), %v608_v8  ;;  %v567_v20 = vmul.f32 (!%p1430_p7), %v561_v13, %v561_v13  ;;  %v568_v21 = vmul.f32 (!%p1430_p7), %v562_v18, %v562_v18  ;;  %v1511_v62 = vld [vmem:[%s1938_s4] sm:$0xff] (!%p1430_p7)  }
 0x274   : > { %667 = vperm.xlu0 (!%p1430_p7), %1508, %v657_v12  }
 0x275   : > { %681 = vperm.xlu1 %1509, %v659_v17   ;;  %v569_v22 = vsub.f32 %v565_v14, %v567_v20  ;;  %v570_v23 = vsub.f32 %v566_v19, %v568_v21  ;;  %vm857_vm10 = vcmask (%p345_p5), 7168  }
 0x276   : > { %1434 = vmatmul.mubr.msk.bf16.vlgmr.msra.gmra.mrb[0].mxu1 %vm599_vm8, %v1510_v9 }
 0x277   : > { %v571_v24 = vmax.f32 %v569_v22, 0.0  ;;  %737 = vmatprep.mubr.bf16.mxu1 %v1580_v5  ;;  %v572_v25 = vmax.f32 %v570_v23, 0.0  ;;  %v1512_v23 = vld [vmem:[%s1941_s7] sm:$0xff]  }
 0x279   : > { %v575_v26 = vadd.f32 1e-05, %v571_v24  ;;  %v576_v27 = vadd.f32 1e-05, %v572_v25  ;;  %v1513_v24 = vld [vmem:[%s1941_s7 + $0x8] sm:$0xff]  }
 0x27b   : > { %1514 = vrsqrt.f32 %v575_v26 }
 0x27c   : > { %1516 = vrsqrt.f32 %v576_v27 }
 0x285   : > { %v1515_v30 = vpop.eup %1514 }
 0x286   : > { %v1517_v31 = vpop.eup %1516  ;;  %v579_v32 = vmul.f32 %v1515_v30, %v573_v28 }
 0x287   : > { %v580_v33 = vmul.f32 %v1517_v31, %v574_v29 }
 0x288   : > { %750 = vperm.xlu0 %1508, %v579_v32   ;;  %v583_v35 = vmul.f32 %v579_v32, %v561_v13 }
 0x289   : > { %755 = vperm.xlu1 %1509, %v580_v33   ;;  %v584_v37 = vmul.f32 %v580_v33, %v562_v18  ;;  %v1581_v33 = vmov (%p345_p5), 0.0  }
 0x28a   : > { %v585_v38 = vsub.f32 %v581_v34, %v583_v35  ;;  %858 = vst.msk [vmem:[#allocation4] sm:$0xff] (%p345_p5), %vm857_vm10, %v1581_v33  ;;  %859 = vst.msk [vmem:[#allocation4 + $0x8] sm:$0xff] (%p345_p5), %vm857_vm10, %v1581_v33 }
 0x28b   : > { %v586_v39 = vsub.f32 %v582_v36, %v584_v37  ;;  %860 = vst.msk [vmem:[#allocation4 + $0x10] sm:$0xff] (%p345_p5), %vm857_vm10, %v1581_v33  ;;  %861 = vst.msk [vmem:[#allocation4 + $0x18] sm:$0xff] (%p345_p5), %vm857_vm10, %v1581_v33 }
 0x28c   : > { %764 = vperm.xlu0 %1508, %v585_v38   ;;  %862 = vst.msk [vmem:[#allocation5] sm:$0xff] (%p345_p5), %vm857_vm10, %v1581_v33  ;;  %863 = vst.msk [vmem:[#allocation5 + $0x8] sm:$0xff] (%p345_p5), %vm857_vm10, %v1581_v33 }
 0x28d   : > { %769 = vperm.xlu1 %1509, %v586_v39   ;;  %864 = vst.msk [vmem:[#allocation5 + $0x10] sm:$0xff] (%p345_p5), %vm857_vm10, %v1581_v33  ;;  %865 = vst.msk [vmem:[#allocation5 + $0x18] sm:$0xff] (%p345_p5), %vm857_vm10, %v1581_v33 }
 0x2ef   : > { %v663_v40 = vpop.permute.xlu0 %662 }
 0x2f0   : > { %v677_v41 = vpop.permute.xlu1 %676 }
 0x2f3   : > { %v668_v45 = vpop.permute.xlu0 %667 }
 0x2f4   : > { %v682_v51 = vpop.permute.xlu1 %681 }
 0x307   : > { %v751_v63 = vpop.permute.xlu0 %750 }
 0x308   : > { %v756_v1 = vpop.permute.xlu1 %755 }
 0x30b   : > { %v765_v6 = vpop.permute.xlu0 %764 }
 0x30c   : > { %v770_v12 = vpop.permute.xlu1 %769 }
 0x349   : > { %v647_v42 = vpop.f32.mrb[0].mxu1 }
 0x34a   : > { %v670_v43 = vmul.f32 %v663_v40, %v647_v42  ;;  %v649_v44 = vpop.f32.mrb[1].mxu1 }
 0x34b   : > { %v671_v46 = vmul.f32 %v663_v40, %v649_v44  ;;  %v651_v47 = vpop.f32.mrb[2].mxu1 }
 0x34c   : > { %v684_v48 = vadd.f32 %v677_v41, %v670_v43  ;;  %v672_v49 = vmul.f32 %v668_v45, %v651_v47  ;;  %v653_v50 = vpop.f32.mrb[3].mxu1 }
 0x34d   : > { %v685_v52 = vadd.f32 %v677_v41, %v671_v46  ;;  %v673_v53 = vmul.f32 %v668_v45, %v653_v50 }
 0x34e   : > { %v686_v54 = vadd.f32 %v682_v51, %v672_v49  ;;  %v688_v56 = vmax.f32 %v684_v48, 0.0 }
 0x34f   : > { %v687_v55 = vadd.f32 %v682_v51, %v673_v53  ;;  %v689_v58 = vmax.f32 %v685_v52, 0.0 }
 0x350   : > { %v690_v57 = vmax.f32 %v686_v54, 0.0 }
 0x351   : > { %v691_v59 = vmax.f32 %v687_v55, 0.0 }
 0x352   : > { %v694_v60 = vpack.c.bf16 %v690_v57, %v688_v56 }
 0x353   : > { %v695_v61 = vpack.c.bf16 %v691_v59, %v689_v58 }
 0x355   : > { %705 = vmatprep.subr.bf16.mxu1 %v695_v61 }
 0x356   : > { %706 = vmatpush1.bf16.msra.mxu1 %v694_v60 }
 0x359   : > { %1436 = vmatmul.mubr.msk.bf16.vlgmr.msra.gmra.mrb[4].mxu1 %vm701_vm9, %v1511_v62 }
 0x42c   : > { %v739_v2 = vpop.f32.mrb[4].mxu1 }
 0x42d   : > { %v758_v3 = vmul.f32 %v751_v63, %v739_v2  ;;  %v741_v4 = vpop.f32.mrb[5].mxu1 }
 0x42e   : > { %v759_v7 = vmul.f32 %v751_v63, %v741_v4  ;;  %v743_v8 = vpop.f32.mrb[6].mxu1 }
 0x42f   : > { %v772_v9 = vadd.f32 %v765_v6, %v758_v3  ;;  %v760_v10 = vmul.f32 %v756_v1, %v743_v8  ;;  %v745_v11 = vpop.f32.mrb[7].mxu1 }
 0x430   : > { %v761_v13 = vmul.f32 %v756_v1, %v745_v11  ;;  %v773_v14 = vadd.f32 %v765_v6, %v759_v7 }
 0x431   : > { %v774_v15 = vadd.f32 %v770_v12, %v760_v10  ;;  %v776_v17 = vmax.f32 %v772_v9, 0.0 }
 0x432   : > { %v775_v16 = vadd.f32 %v770_v12, %v761_v13  ;;  %v777_v19 = vmax.f32 %v773_v14, 0.0 }
 0x433   : > { %v778_v18 = vmax.f32 %v774_v15, 0.0 }
 0x434   : > { %v779_v20 = vmax.f32 %v775_v16, 0.0 }
 0x435   : > { %v784_v21 = vpack.c.bf16 %v778_v18, %v776_v17 }
 0x436   : > { %v785_v22 = vpack.c.bf16 %v779_v20, %v777_v19 }
 0x438   : > { %802 = vmatprep.subr.bf16.mxu0 %v785_v22 }
 0x439   : > { %803 = vmatpush1.bf16.msra.mxu0 %v784_v21 }
 0x43c   : > { %1439 = vmatmul.mubr.msk.bf16.vlgmr.msra.gmra.mrb[0].mxu0 %vm701_vm9, %v1512_v23 }
 0x43d   : > { %844 = vmatprep.mubr.bf16.mxu0 %v1580_v5 }
 0x444   : > { %1440 = vmatmul.mubr.msk.bf16.gmra.mrb[4].mxu0 %vm701_vm9, %v1513_v24 }
 0x50f   : > { %v836_v25 = vpop.f32.mrb[0].mxu0 }
 0x510   : > { %v838_v26 = vpop.f32.mrb[1].mxu0 }
 0x511   : > { %v840_v27 = vpop.f32.mrb[2].mxu0 }
 0x512   : > { %v842_v28 = vpop.f32.mrb[3].mxu0 }
 0x514   : > { %856 = sbr.rel (!%p345_p5) target bundleno = 1307 (0x51b), region = 76 }
 0x517   : > { %v846_v29 = vpop.f32.mrb[4].mxu0 }
 0x518   : > { %v848_v30 = vpop.f32.mrb[5].mxu0 }
 0x519   : > { %v850_v31 = vpop.f32.mrb[6].mxu0 }
 0x51a   : > { %v852_v32 = vpop.f32.mrb[7].mxu0 }
 0x51b PF: > { %v876_v5 = vadd.f32 %v848_v30, %v846_v29  ;;  %v870_v34 = vadd.f32 %v838_v26, %v836_v25  ;;  %v879_v35 = vadd.f32 %v852_v32, %v850_v31  ;;  %v873_v36 = vadd.f32 %v842_v28, %v840_v27  ;;  %v868_v49 = vld [vmem:[#allocation4 + $0x10] sm:$0xff]  ;;  %v866_v50 = vld [vmem:[#allocation4] sm:$0xff]  ;;  %v869_v55 = vld [vmem:[#allocation4 + $0x18] sm:$0xff] }
 0x51c   : > { %v897_v37 = vmul.f32 %v840_v27, %v840_v27  ;;  %v898_v38 = vmul.f32 %v842_v28, %v842_v28  ;;  %v895_v39 = vmul.f32 %v836_v25, %v836_v25  ;;  %v896_v40 = vmul.f32 %v838_v26, %v838_v26  ;;  %v867_v56 = vld [vmem:[#allocation4 + $0x8] sm:$0xff]  ;;  %v891_v62 = vld [vmem:[#allocation5] sm:$0xff]  ;;  %v894_v4 = vld [vmem:[#allocation5 + $0x18] sm:$0xff] }
 0x51d   : > { %877 = vadd.xlane.f32.xlu1 %v876_v5  ;;  %871 = vadd.xlane.f32.xlu0 %v870_v34  ;;  %v901_v41 = vmul.f32 %v850_v31, %v850_v31  ;;  %v902_v42 = vmul.f32 %v852_v32, %v852_v32  ;;  %v899_v43 = vmul.f32 %v846_v29, %v846_v29  ;;  %vm886_vm11 = vcmask 7168   ;;  %v892_v61 = vld [vmem:[#allocation5 + $0x8] sm:$0xff]  ;;  %v893_v6 = vld [vmem:[#allocation5 + $0x10] sm:$0xff] }
 0x51e   : > { %v906_v44 = vadd.f32 %v898_v38, %v897_v37  ;;  %v903_v45 = vadd.f32 %v896_v40, %v895_v39  ;;  %v900_v46 = vmul.f32 %v848_v30, %v848_v30 }
 0x51f   : > { %v912_v47 = vadd.f32 %v902_v42, %v901_v41 }
 0x520   : > { %v909_v48 = vadd.f32 %v900_v46, %v899_v43 }
 0x521   : > { %880 = vadd.xlane.f32.xlu1 %v879_v35  ;;  %874 = vadd.xlane.f32.xlu0 %v873_v36 }
 0x525   : > { %907 = vadd.xlane.f32.xlu1 %v906_v44  ;;  %904 = vadd.xlane.f32.xlu0 %v903_v45 }
 0x529   : > { %913 = vadd.xlane.f32.xlu1 %v912_v47  ;;  %910 = vadd.xlane.f32.xlu0 %v909_v48 }
 0x5aa   : > { %v878_v51 = vpop.xlane.xlu1 %877  ;;  %v872_v52 = vpop.xlane.xlu0 %871 }
 0x5ab   : > { %v884_v53 = vadd.f32 %v878_v51, %v868_v49  ;;  %v882_v54 = vadd.f32 %v872_v52, %v866_v50 }
 0x5ad   : > { %889 = vst.msk [vmem:[#allocation4 + $0x10] sm:$0xff] %vm886_vm11, %v884_v53  ;;  %887 = vst.msk [vmem:[#allocation4] sm:$0xff] %vm886_vm11, %v882_v54 }
 0x5ae   : > { %v881_v57 = vpop.xlane.xlu1 %880  ;;  %v875_v58 = vpop.xlane.xlu0 %874 }
 0x5af   : > { %v885_v59 = vadd.f32 %v881_v57, %v869_v55  ;;  %v883_v60 = vadd.f32 %v875_v58, %v867_v56 }
 0x5b1   : > { %890 = vst.msk [vmem:[#allocation4 + $0x18] sm:$0xff] %vm886_vm11, %v885_v59  ;;  %888 = vst.msk [vmem:[#allocation4 + $0x8] sm:$0xff] %vm886_vm11, %v883_v60 }
 0x5b2   : > { %v908_v63 = vpop.xlane.xlu1 %907  ;;  %v905_v1 = vpop.xlane.xlu0 %904 }
 0x5b3   : > { %v916_v2 = vadd.f32 %v908_v63, %v892_v61  ;;  %v915_v3 = vadd.f32 %v905_v1, %v891_v62 }
 0x5b5   : > { %920 = vst.msk [vmem:[#allocation5 + $0x8] sm:$0xff] %vm886_vm11, %v916_v2  ;;  %919 = vst.msk [vmem:[#allocation5] sm:$0xff] %vm886_vm11, %v915_v3 }
 0x5b6   : > { %v914_v7 = vpop.xlane.xlu1 %913  ;;  %v911_v8 = vpop.xlane.xlu0 %910 }
 0x5b7   : > { %v918_v9 = vadd.f32 %v914_v7, %v894_v4  ;;  %v917_v10 = vadd.f32 %v911_v8, %v893_v6 }
 0x5b9   : > { %922 = vst.msk [vmem:[#allocation5 + $0x18] sm:$0xff] %vm886_vm11, %v918_v9  ;;  %921 = vst.msk [vmem:[#allocation5 + $0x10] sm:$0xff] %vm886_vm11, %v917_v10 }
 0x5ba PF: > { %p1441_p8 = scmp.ne.s32.totalorder %s1562_s14, 2 }
 0x5bb   : > { %v1444_v11 = vcombine.high (!%p1441_p8), %v1678_v0, %v1678_v0  ;;  %vm1027_vm12 = vcmask (!%p1441_p8), 1042432   ;;  %vm1028_vm13 = vcmask (!%p1441_p8), 1043456   ;;  %v1582_v12 = vmov (!%p1441_p8), 65535   ;;  %v1080_v15 = vld [vmem:[%s1936_s2] sm:$0xff] (!%p1441_p8)  ;;  %v931_v21 = vld [vmem:[#allocation3] sm:$0xff] (!%p1441_p8)  ;;  %v1081_v22 = vld [vmem:[%s1936_s2 + $0x8] sm:$0xff] (!%p1441_p8) }
 0x5bc   : > { %926 = sbr.rel (%p1441_p8) target bundleno = 2309 (0x905), region = 80  ;;  %v1029_v13 = vsel (!%p1441_p8), %vm1027_vm12, 4294967295, %v1582_v12  ;;  %v1443_v14 = vcombine.low (!%p1441_p8), %v1678_v0, %v1678_v0  ;;  %v1583_v17 = vmov (!%p1441_p8), 0   ;;  %v1082_v18 = vld [vmem:[%s1937_s3] sm:$0xff] (!%p1441_p8)  ;;  %v933_v24 = vmul.f32 (!%p1441_p8), 0.001953125, %v931_v21  ;;  %v928_v25 = vld [vmem:[#allocation2 + $0x8] sm:$0xff] (!%p1441_p8) }
 0x5bd   : > { %v1030_v16 = vsel (!%p1441_p8), %vm1028_vm13, %v1029_v13, 0  ;;  %1069 = vmatprep.mubr.bf16.mxu1 (!%p1441_p8), %v1583_v17  ;;  %1518 = vset.pattern.permute.xlu0 (!%p1441_p8), %v1583_v17  ;;  %v927_v0 = vld [vmem:[#allocation2] sm:$0xff] (!%p1441_p8)  ;;  %v932_v26 = vld [vmem:[#allocation3 + $0x8] sm:$0xff] (!%p1441_p8)  ;;  %v1083_v28 = vld [vmem:[%s1937_s3 + $0x8] sm:$0xff] (!%p1441_p8)  ;;  %v1791_v29 = vmul.f32 (!%p1441_p8), 0.001953125, %v928_v25  ;;  %vm1023_vm14 = vcmask (!%p1441_p8), 56320  }
 0x5be   : > { %v1035_v19 = vand.u32 (!%p1441_p8), %v1444_v11, %v1030_v16  ;;  %v1032_v20 = vand.u32 (!%p1441_p8), %v1443_v14, %v1030_v16  ;;  %1086 = vperm.xlu0 (!%p1441_p8), %1518, %v1080_v15   ;;  %1519 = vset.pattern.permute.xlu1 (!%p1441_p8), %v1583_v17  ;;  %v1782_v23 = vmul.f32 (!%p1441_p8), 0.001953125, %v927_v0  ;;  %v1520_v27 = vld [vmem:[%s1935_s1] sm:$0xff] (!%p1441_p8)   ;;  %v934_v30 = vmul.f32 (!%p1441_p8), 0.001953125, %v932_v26  ;;  %v956_v34 = vld [vmem:[#allocation4 + $0x8] sm:$0xff] (!%p1441_p8)  ;;  %v957_v39 = vld [vmem:[#allocation4 + $0x10] sm:$0xff] (!%p1441_p8) }
 0x5bf   : > { %1100 = vperm.xlu1 (!%p1441_p8), %1519, %v1082_v18   ;;  %1258 = vmatprep.mubr.bf16.mxu0 (!%p1441_p8), %v1583_v17  ;;  %v955_v31 = vld [vmem:[#allocation4] sm:$0xff] (!%p1441_p8)  ;;  %v936_v35 = vmul.f32 (!%p1441_p8), %v1791_v29, %v1791_v29  ;;  %v1799_v37 = vmul.f32 (!%p1441_p8), 0.001953125, %v956_v34  ;;  %v964_v38 = vld [vmem:[#allocation5 + $0x8] sm:$0xff] (!%p1441_p8)  ;;  %v1803_v43 = vmul.f32 (!%p1441_p8), 0.001953125, %v957_v39  ;;  %v958_v45 = vld [vmem:[#allocation4 + $0x18] sm:$0xff] (!%p1441_p8)  ;;  %vm1125_vm15 = vcmask (!%p1441_p8), 130048  }
 0x5c0   : > { %1037 = vmatprep.subr.bf16.mxu1 (!%p1441_p8), %v1035_v19  ;;  %v935_v32 = vmul.f32 (!%p1441_p8), %v1782_v23, %v1782_v23  ;;  %v1795_v33 = vmul.f32 (!%p1441_p8), 0.001953125, %v955_v31  ;;  %v963_v5 = vld [vmem:[#allocation5] sm:$0xff] (!%p1441_p8)  ;;  %v968_v42 = vmul.f32 (!%p1441_p8), 0.001953125, %v964_v38  ;;  %v965_v44 = vld [vmem:[#allocation5 + $0x10] sm:$0xff] (!%p1441_p8)  ;;  %v1808_v49 = vmul.f32 (!%p1441_p8), 0.001953125, %v958_v45  ;;  %v966_v50 = vld [vmem:[#allocation5 + $0x18] sm:$0xff] (!%p1441_p8) }
 0x5c1   : > { %1038 = vmatpush1.bf16.msra.mxu1 (!%p1441_p8), %v1032_v20  ;;  %v967_v36 = vmul.f32 (!%p1441_p8), 0.001953125, %v963_v5  ;;  %v938_v46 = vsub.f32 (!%p1441_p8), %v934_v30, %v936_v35  ;;  %v972_v47 = vmul.f32 (!%p1441_p8), %v1799_v37, %v1799_v37  ;;  %v969_v48 = vmul.f32 (!%p1441_p8), 0.001953125, %v965_v44  ;;  %v941_v8 = vld [vmem:[%s1939_s5] sm:$0xff] (!%p1441_p8)  ;;  %v942_v9 = vld [vmem:[%s1939_s5 + $0x8] sm:$0xff] (!%p1441_p8) }
 0x5c2   : > { %1091 = vperm.xlu0 (!%p1441_p8), %1518, %v1081_v22   ;;  %v937_v40 = vsub.f32 (!%p1441_p8), %v933_v24, %v935_v32  ;;  %v971_v41 = vmul.f32 (!%p1441_p8), %v1795_v33, %v1795_v33  ;;  %v973_v53 = vmul.f32 (!%p1441_p8), %v1803_v43, %v1803_v43  ;;  %v970_v54 = vmul.f32 (!%p1441_p8), 0.001953125, %v966_v50  ;;  %v949_v14 = vld [vmem:[%s1940_s6] sm:$0xff] (!%p1441_p8)  ;;  %v950_v16 = vld [vmem:[%s1940_s6 + $0x8] sm:$0xff] (!%p1441_p8) }
 0x5c3   : > { %1105 = vperm.xlu1 %1519, %v1083_v28   ;;  %v940_v55 = vmax.f32 %v938_v46, 0.0  ;;  %v976_v56 = vsub.f32 %v968_v42, %v972_v47  ;;  %v974_v57 = vmul.f32 %v1808_v49, %v1808_v49  ;;  %v983_v20 = vld [vmem:[%s1942_s8] sm:$0xff]  ;;  %v984_v22 = vld [vmem:[%s1942_s8 + $0x8] sm:$0xff]  ;;  %vm1379_vm1 = vcmask 15360  }
 0x5c4   : > { %1445 = vmatmul.mubr.msk.bf16.vlgmr.msra.gmra.mrb[0].mxu1 %vm1023_vm14, %v1520_v27  ;;  %v939_v51 = vmax.f32 %v937_v40, 0.0  ;;  %v975_v52 = vsub.f32 %v967_v36, %v971_v41  ;;  %v977_v60 = vsub.f32 %v969_v48, %v973_v53  ;;  %v985_v27 = vld [vmem:[%s1942_s8 + $0x10] sm:$0xff]  ;;  %v999_v5 = vld [vmem:[%s1943_s9] sm:$0xff]  ;;  %v1000_v35 = vld [vmem:[%s1943_s9 + $0x8] sm:$0xff] }
 0x5c5   : > { %1161 = vmatprep.mubr.bf16.mxu1 %v1583_v17  ;;  %v944_v61 = vadd.f32 1e-05, %v940_v55  ;;  %v980_v62 = vmax.f32 %v976_v56, 0.0  ;;  %v978_v63 = vsub.f32 %v970_v54, %v974_v57 }
 0x5c6   : > { %v943_v58 = vadd.f32 1e-05, %v939_v51  ;;  %v979_v59 = vmax.f32 %v975_v52, 0.0  ;;  %v981_v2 = vmax.f32 %v977_v60, 0.0 }
 0x5c7   : > { %v988_v3 = vadd.f32 1e-05, %v980_v62  ;;  %v982_v4 = vmax.f32 %v978_v63, 0.0 }
 0x5c8   : > { %1524 = vrsqrt.f32 %v943_v58  ;;  %v987_v1 = vadd.f32 1e-05, %v979_v59  ;;  %v989_v6 = vadd.f32 1e-05, %v981_v2  ;;  %v1521_v2 = vld [vmem:[%s1938_s4] sm:$0xff]  }
 0x5c9   : > { %1526 = vrsqrt.f32 %v944_v61  ;;  %v990_v7 = vadd.f32 1e-05, %v982_v4 }
 0x5ca   : > { %1528 = vrsqrt.f32 %v987_v1 }
 0x5cb   : > { %1530 = vrsqrt.f32 %v988_v3 }
 0x5cc   : > { %1532 = vrsqrt.f32 %v989_v6 }
 0x5cd   : > { %1534 = vrsqrt.f32 %v990_v7 }
 0x5d2   : > { %v1525_v10 = vpop.eup %1524 }
 0x5d3   : > { %v1527_v11 = vpop.eup %1526  ;;  %v947_v12 = vmul.f32 %v1525_v10, %v941_v8 }
 0x5d4   : > { %v948_v13 = vmul.f32 %v1527_v11, %v942_v9  ;;  %v1529_v18 = vpop.eup %1528 }
 0x5d5   : > { %1174 = vperm.xlu0 %1518, %v947_v12   ;;  %v951_v15 = vmul.f32 %v947_v12, %v1782_v23  ;;  %v1531_v0 = vpop.eup %1530  ;;  %v995_v23 = vmul.f32 %v1529_v18, %v983_v20 }
 0x5d6   : > { %1179 = vperm.xlu1 %1519, %v948_v13   ;;  %v952_v19 = vmul.f32 %v948_v13, %v1791_v29  ;;  %v1533_v25 = vpop.eup %1532  ;;  %v996_v26 = vmul.f32 %v1531_v0, %v984_v22  ;;  %v986_v29 = vld [vmem:[%s1942_s8 + $0x18] sm:$0xff] }
 0x5d7   : > { %v953_v21 = vsub.f32 %v949_v14, %v951_v15  ;;  %v1535_v28 = vpop.eup %1534  ;;  %v997_v30 = vmul.f32 %v1533_v25, %v985_v27  ;;  %v1003_v31 = vmul.f32 %v995_v23, %v1795_v33  ;;  %v1001_v33 = vld [vmem:[%s1943_s9 + $0x10] sm:$0xff]  ;;  %v1523_v27 = vld [vmem:[%s1941_s7 + $0x8] sm:$0xff]  }
 0x5d8   : > { %v954_v24 = vsub.f32 %v950_v16, %v952_v19  ;;  %v998_v32 = vmul.f32 %v1535_v28, %v986_v29  ;;  %v1004_v34 = vmul.f32 %v996_v26, %v1799_v37  ;;  %v1002_v37 = vld [vmem:[%s1943_s9 + $0x18] sm:$0xff] }
 0x5d9   : > { %1188 = vperm.xlu0 %1518, %v953_v21   ;;  %v1007_v36 = vsub.f32 %v999_v5, %v1003_v31  ;;  %v1005_v38 = vmul.f32 %v997_v30, %v1803_v43 }
 0x5da   : > { %1193 = vperm.xlu1 %1519, %v954_v24   ;;  %v1008_v39 = vsub.f32 %v1000_v35, %v1004_v34  ;;  %v1006_v40 = vmul.f32 %v998_v32, %v1808_v49 }
 0x5db   : > { %v1009_v41 = vsub.f32 %v1001_v33, %v1005_v38 }
 0x5dc   : > { %v1010_v42 = vsub.f32 %v1002_v37, %v1006_v40 }
 0x5dd   : > { %1281 = vperm.xlu0 %1518, %v995_v23  }
 0x5de   : > { %1286 = vperm.xlu1 %1519, %v996_v26   ;;  %v1522_v26 = vld [vmem:[%s1941_s7] sm:$0xff]  }
 0x5e1   : > { %1291 = vperm.xlu0 %1518, %v997_v30  }
 0x5e2   : > { %1296 = vperm.xlu1 %1519, %v998_v32  }
 0x5e5   : > { %1309 = vperm.xlu0 %1518, %v1007_v36  }
 0x5e6   : > { %1314 = vperm.xlu1 %1519, %v1008_v39  }
 0x5e9   : > { %1319 = vperm.xlu0 %1518, %v1009_v41  }
 0x5ea   : > { %1324 = vperm.xlu1 %1519, %v1010_v42  }
 0x63d   : > { %v1087_v44 = vpop.permute.xlu0 %1086 }
 0x63e   : > { %v1101_v43 = vpop.permute.xlu1 %1100 }
 0x641   : > { %v1092_v48 = vpop.permute.xlu0 %1091 }
 0x642   : > { %v1106_v54 = vpop.permute.xlu1 %1105 }
 0x654   : > { %v1175_v3 = vpop.permute.xlu0 %1174 }
 0x655   : > { %v1180_v4 = vpop.permute.xlu1 %1179 }
 0x658   : > { %v1189_v9 = vpop.permute.xlu0 %1188 }
 0x659   : > { %v1194_v15 = vpop.permute.xlu1 %1193 }
 0x65c   : > { %v1282_v28 = vpop.permute.xlu0 %1281 }
 0x65d   : > { %v1287_v29 = vpop.permute.xlu1 %1286 }
 0x660   : > { %v1292_v30 = vpop.permute.xlu0 %1291 }
 0x661   : > { %v1297_v31 = vpop.permute.xlu1 %1296 }
 0x664   : > { %v1310_v35 = vpop.permute.xlu0 %1309 }
 0x697   : > { %v1071_v45 = vpop.f32.mrb[0].mxu1 }
 0x698   : > { %v1094_v46 = vmul.f32 %v1087_v44, %v1071_v45  ;;  %v1073_v47 = vpop.f32.mrb[1].mxu1 }
 0x699   : > { %v1095_v50 = vmul.f32 %v1087_v44, %v1073_v47  ;;  %v1075_v51 = vpop.f32.mrb[2].mxu1 }
 0x69a   : > { %v1108_v52 = vadd.f32 %v1101_v43, %v1094_v46  ;;  %v1096_v49 = vmul.f32 %v1092_v48, %v1075_v51  ;;  %v1077_v53 = vpop.f32.mrb[3].mxu1 }
 0x69b   : > { %v1109_v55 = vadd.f32 %v1101_v43, %v1095_v50  ;;  %v1097_v56 = vmul.f32 %v1092_v48, %v1077_v53 }
 0x69c   : > { %v1110_v57 = vadd.f32 %v1106_v54, %v1096_v49  ;;  %v1112_v59 = vmax.f32 %v1108_v52, 0.0  ;;  %v1320_v49 = vpop.permute.xlu0 %1319 }
 0x69d   : > { %v1111_v58 = vadd.f32 %v1106_v54, %v1097_v56  ;;  %v1113_v61 = vmax.f32 %v1109_v55, 0.0 }
 0x69e   : > { %v1114_v60 = vmax.f32 %v1110_v57, 0.0 }
 0x69f   : > { %v1115_v62 = vmax.f32 %v1111_v58, 0.0 }
 0x6a0   : > { %v1118_v63 = vpack.c.bf16 %v1114_v60, %v1112_v59 }
 0x6a1   : > { %v1119_v1 = vpack.c.bf16 %v1115_v62, %v1113_v61 }
 0x6a3   : > { %1129 = vmatprep.subr.bf16.mxu1 %v1119_v1 }
 0x6a4   : > { %1130 = vmatpush1.bf16.msra.mxu1 %v1118_v63 }
 0x6a7   : > { %1447 = vmatmul.mubr.msk.bf16.vlgmr.msra.gmra.mrb[4].mxu1 %vm1125_vm15, %v1521_v2 }
 0x77a   : > { %v1163_v6 = vpop.f32.mrb[4].mxu1 }
 0x77b   : > { %v1182_v7 = vmul.f32 %v1175_v3, %v1163_v6  ;;  %v1165_v8 = vpop.f32.mrb[5].mxu1 }
 0x77c   : > { %v1183_v10 = vmul.f32 %v1175_v3, %v1165_v8  ;;  %v1167_v11 = vpop.f32.mrb[6].mxu1  ;;  %v1355_v8 = vlaneseq }
 0x77d   : > { %v1196_v12 = vadd.f32 %v1189_v9, %v1182_v7  ;;  %v1184_v13 = vmul.f32 %v1180_v4, %v1167_v11  ;;  %v1169_v14 = vpop.f32.mrb[7].mxu1  ;;  %v1357_v11 = vld [vmem:[%s1944_s10] sm:$0xff] }
 0x77e   : > { %v1185_v16 = vmul.f32 %v1180_v4, %v1169_v14  ;;  %v1197_v18 = vadd.f32 %v1189_v9, %v1183_v10  ;;  %v1356_v9 = vand.u32 127, %v1355_v8  ;;  %v1361_v10 = vstv %s1558_s13 }
 0x77f   : > { %v1198_v19 = vadd.f32 %v1194_v15, %v1184_v13  ;;  %v1200_v0 = vmax.f32 %v1196_v12, 0.0  ;;  %v1358_v13 = vld [vmem:[%s1944_s10 + $0x8] sm:$0xff] }
 0x780   : > { %v1199_v20 = vadd.f32 %v1194_v15, %v1185_v16  ;;  %v1201_v22 = vmax.f32 %v1197_v18, 0.0  ;;  %vm1874_vm0 = vcmp.eq.s32.totalorder %v1356_v9, %v1361_v10 }
 0x781   : > { %v1202_v21 = vmax.f32 %v1198_v19, 0.0  ;;  %v1367_v14 = vsel %vm1874_vm0, -inf, %v1357_v11  ;;  %v1368_v16 = vsel %vm1874_vm0, -inf, %v1358_v13 }
 0x782   : > { %v1203_v24 = vmax.f32 %v1199_v20, 0.0 }
 0x783   : > { %v1208_v23 = vpack.c.bf16 %v1202_v21, %v1200_v0  ;;  %v1359_v21 = vld [vmem:[%s1944_s10 + $0x10] sm:$0xff] }
 0x784   : > { %v1209_v25 = vpack.c.bf16 %v1203_v24, %v1201_v22  ;;  %v1369_v24 = vsel %vm1874_vm0, -inf, %v1359_v21 }
 0x786   : > { %1226 = vmatprep.subr.bf16.mxu0 %v1209_v25 }
 0x787   : > { %1227 = vmatpush1.bf16.msra.mxu0 %v1208_v23  ;;  %v1360_v23 = vld [vmem:[%s1944_s10 + $0x18] sm:$0xff] }
 0x78a   : > { %1450 = vmatmul.mubr.msk.bf16.vlgmr.msra.gmra.mrb[0].mxu0 %vm1125_vm15, %v1522_v26 }
 0x78b   : > { %1268 = vmatprep.mubr.bf16.mxu0 %v1583_v17  ;;  %v1315_v17 = vpop.permute.xlu1 %1314 }
 0x78f   : > { %v1325_v59 = vpop.permute.xlu1 %1324 }
 0x792   : > { %1451 = vmatmul.mubr.msk.bf16.gmra.mrb[4].mxu0 %vm1125_vm15, %v1523_v27  ;;  %v1370_v27 = vsel %vm1874_vm0, -inf, %v1360_v23 }
 0x85d   : > { %v1260_v32 = vpop.f32.mrb[0].mxu0 }
 0x85e   : > { %v1299_v5 = vmul.f32 %v1282_v28, %v1260_v32  ;;  %v1262_v34 = vpop.f32.mrb[1].mxu0 }
 0x85f   : > { %v1300_v36 = vmul.f32 %v1282_v28, %v1262_v34  ;;  %v1264_v38 = vpop.f32.mrb[2].mxu0 }
 0x860   : > { %v1327_v39 = vadd.f32 %v1310_v35, %v1299_v5  ;;  %v1301_v33 = vmul.f32 %v1287_v29, %v1264_v38  ;;  %v1266_v40 = vpop.f32.mrb[3].mxu0 }
 0x861   : > { %v1328_v37 = vadd.f32 %v1310_v35, %v1300_v36  ;;  %v1302_v41 = vmul.f32 %v1287_v29, %v1266_v40 }
 0x862   : > { %v1335_v42 = vmax.f32 %v1327_v39, 0.0  ;;  %v1329_v44 = vadd.f32 %v1315_v17, %v1301_v33 }
 0x863   : > { %v1336_v43 = vmax.f32 %v1328_v37, 0.0  ;;  %v1330_v45 = vadd.f32 %v1315_v17, %v1302_v41 }
 0x864   : > { %v1337_v46 = vmax.f32 %v1329_v44, 0.0 }
 0x865   : > { %v1338_v47 = vmax.f32 %v1330_v45, 0.0  ;;  %v1270_v48 = vpop.f32.mrb[4].mxu0  ;;  %v1343_v50 = vmax.f32 %v1335_v42, %v1336_v43 }
 0x866   : > { %v1303_v51 = vmul.f32 %v1292_v30, %v1270_v48  ;;  %v1272_v52 = vpop.f32.mrb[5].mxu0 }
 0x867   : > { %v1304_v53 = vmul.f32 %v1292_v30, %v1272_v52  ;;  %v1274_v54 = vpop.f32.mrb[6].mxu0  ;;  %1344 = vmax.xlane.f32.xlu0 %v1343_v50  ;;  %v1346_v55 = vmax.f32 %v1337_v46, %v1338_v47 }
 0x868   : > { %v1331_v56 = vadd.f32 %v1320_v49, %v1303_v51  ;;  %v1305_v57 = vmul.f32 %v1297_v31, %v1274_v54  ;;  %v1276_v58 = vpop.f32.mrb[7].mxu0 }
 0x869   : > { %v1332_v60 = vadd.f32 %v1320_v49, %v1304_v53  ;;  %v1306_v61 = vmul.f32 %v1297_v31, %v1276_v58  ;;  %1347 = vmax.xlane.f32.xlu1 %v1346_v55 }
 0x86a   : > { %v1339_v62 = vmax.f32 %v1331_v56, 0.0  ;;  %v1333_v63 = vadd.f32 %v1325_v59, %v1305_v57 }
 0x86b   : > { %v1340_v1 = vmax.f32 %v1332_v60, 0.0  ;;  %v1334_v2 = vadd.f32 %v1325_v59, %v1306_v61 }
 0x86c   : > { %v1341_v3 = vmax.f32 %v1333_v63, 0.0 }
 0x86d   : > { %v1342_v4 = vmax.f32 %v1334_v2, 0.0  ;;  %v1349_v6 = vmax.f32 %v1339_v62, %v1340_v1 }
 0x86f   : > { %1350 = vmax.xlane.f32.xlu0 %v1349_v6  ;;  %v1352_v7 = vmax.f32 %v1341_v3, %v1342_v4 }
 0x873   : > { %1353 = vmax.xlane.f32.xlu0 %v1352_v7 }
 0x8f4   : > { %v1345_v15 = vpop.xlane.xlu0 %1344 }
 0x8f5   : > { %v1371_v18 = vmax.f32 %v1367_v14, %v1345_v15 }
 0x8f6   : > { %v1348_v19 = vpop.xlane.xlu1 %1347 }
 0x8f7   : > { %v1375_v20 = vsel %vm1874_vm0, %v1371_v18, %v1367_v14  ;;  %v1372_v0 = vmax.f32 %v1368_v16, %v1348_v19 }
 0x8f8   : > { %1380 = vst.msk [vmem:[%s1944_s10] sm:$0xff] %vm1379_vm1, %v1375_v20 }
 0x8f9   : > { %v1376_v22 = vsel %vm1874_vm0, %v1372_v0, %v1368_v16 }
 0x8fa   : > { %1381 = vst.msk [vmem:[%s1944_s10 + $0x8] sm:$0xff] %vm1379_vm1, %v1376_v22 }
 0x8fc   : > { %v1351_v25 = vpop.xlane.xlu0 %1350 }
 0x8fd   : > { %v1373_v26 = vmax.f32 %v1369_v24, %v1351_v25 }
 0x8ff   : > { %v1377_v28 = vsel %vm1874_vm0, %v1373_v26, %v1369_v24 }
 0x900   : > { %1382 = vst.msk [vmem:[%s1944_s10 + $0x10] sm:$0xff] %vm1379_vm1, %v1377_v28  ;;  %v1354_v29 = vpop.xlane.xlu0 %1353 }
 0x901   : > { %v1374_v30 = vmax.f32 %v1370_v27, %v1354_v29 }
 0x903   : > { %v1378_v31 = vsel %vm1874_vm0, %v1374_v30, %v1370_v27 }
 0x904   : > { %1383 = vst.msk [vmem:[%s1944_s10 + $0x18] sm:$0xff] %vm1379_vm1, %v1378_v31 }
 0x905 PF: > { %s20_s17 = sadd.s32 1, %s1574_s17   ;;  %s1947_s13 = smov %s1566_s15 }
 0x906   : > { %p17_p9 = scmp.ge.s32.totalorder %s20_s17, 8   ;;  %s1948_s14 = smov %s1570_s16 }
 0x907   : > { %s1949_s15 = smov %s1952_s18  ;;  %s1950_s16 = smov %s1956_s19 }
 0x908   :  { %19 = sbr.rel (!%p17_p9) target bundleno = 3 (0x3), region = 104 }

</bundles_post_ra>
